<compile_context>
chip_gen: v6e
topology: v6e:2x2x1
jax: 0.10.0
libtpu: 0.0.40
codegen_flags: <defaults>
</compile_context>

<pallas_src>
import functools

import jax
import jax.numpy as jnp
from jax.experimental import pallas as pl
from jax.experimental.pallas import tpu as pltpu

EPS = 1e-12          # F.normalize default eps
TEMPERATURE = 0.07   # InfoNCE temperature


# ----------------------------- fused Pallas kernel -----------------------------------

def _fused_kernel(x_ref, w1_ref, b1_ref, w2_ref, b2_ref, *out_refs,
                  num_modalities, emb_dim, compute_loss, temperature):
    """All projection heads + (optionally) all pairwise InfoNCE losses in one kernel.

    x_ref  : (B, Kpad)      bf16, concatenated (and zero-padded) per-modality features
    w1_ref : (Kpad, N*E)    bf16, block-"diagonal" first Linear weights
    b1_ref : (1, N*E)       f32
    w2_ref : (N*E, N*E)     bf16, block-diagonal second Linear weights
    b2_ref : (1, N*E)       f32
    outputs: emb_ref (N, B, E) f32 [, loss_ref (1,1) f32 in SMEM]
    """
    if compute_loss:
        emb_ref, loss_ref = out_refs
    else:
        (emb_ref,) = out_refs

    N, E = num_modalities, emb_dim
    B = x_ref.shape[0]

    # ---- projection heads: 2 wide block-diagonal bf16 matmuls (f32 accumulation) ----
    h = jnp.dot(x_ref[...], w1_ref[...], preferred_element_type=jnp.float32) + b1_ref[...]
    h = jnp.maximum(h, 0.0)                      # ReLU; Dropout is identity at eval
    y = jnp.dot(h.astype(jnp.bfloat16), w2_ref[...],
                preferred_element_type=jnp.float32) + b2_ref[...]

    # ---- per-modality L2 normalize (static 128-lane-aligned slices) ------------------
    embs = []
    for m in range(N):
        ym = y[:, m * E:(m + 1) * E]
        ssq = jnp.sum(ym * ym, axis=-1, keepdims=True)
        # y / max(||y||, eps)  ==  y * rsqrt(max(||y||^2, eps^2))   (EUP rsqrt)
        e = ym * jax.lax.rsqrt(jnp.maximum(ssq, EPS * EPS))
        emb_ref[m] = e
        embs.append(e)

    # ---- symmetric InfoNCE over all modality pairs: ONE MXU call, lane reductions ----
    if compute_loss:
        inv_t = jnp.float32(1.0 / temperature)
        NB = N * B
        S = jnp.concatenate(embs, axis=0)                       # (N*B, E) f32
        # block (i,j) of L == logits(i,j) = (e_i / T) @ e_j^T ; block (j,i) == its T
        L = jax.lax.dot_general(S * inv_t, S, (((1,), (1,)), ((), ())),
                                preferred_element_type=jnp.float32)   # (NB, NB)

        NEG = jnp.float32(-1e30)
        col_ids = jax.lax.broadcasted_iota(jnp.int32, (NB, NB), 1)
        row_ids = jax.lax.broadcasted_iota(jnp.int32, (NB, 1), 0)

        # sum of row-wise LSE over every off-diagonal (i != j) block
        lse_total = jnp.float32(0.0)
        for j in range(N):                       # static unroll over column blocks
            lo, hi = j * B, (j + 1) * B
            col_in = (col_ids >= lo) & (col_ids < hi)
            Lm = jnp.where(col_in, L, NEG)
            mx = jnp.max(Lm, axis=1, keepdims=True)
            lse = mx + jnp.log(jnp.sum(jnp.exp(Lm - mx), axis=1, keepdims=True))
            row_in = (row_ids >= lo) & (row_ids < hi)      # exclude diagonal block i==j
            lse_total = lse_total + jnp.sum(jnp.where(row_in, 0.0, lse))

        # sum of diagonal logits over unordered pairs, directly from embeddings
        diag_total = jnp.float32(0.0)
        for i in range(N):
            for j in range(i + 1, N):
                diag_total = diag_total + jnp.sum(embs[i] * embs[j])

        pairs = N * (N - 1) // 2
        # mean over pairs of 0.5*(CE(logits) + CE(logits.T)) with diagonal targets
        loss_ref[0, 0] = (lse_total - 2.0 * inv_t * diag_total) / (2.0 * B * pairs)


def cross_modal_fused(feats, packed, *, compute_loss, temperature=TEMPERATURE):
    """Run the fused kernel.

    feats  : list of (B, K_m) f32 feature matrices (one per modality, fixed order)
    packed : dict from CrossModalModelPallas._pack (precomputed block-diag bf16 params)
    Returns (embeddings (N, B, E) f32, loss-or-None).
    """
    num_modalities = len(feats)
    B = feats[0].shape[0]
    E = packed["emb_dim"]
    k_pad = packed["k_pad"]

    # one concat + pad + bf16 cast per call (weights are prepacked at init)
    x = jnp.concatenate([f.astype(jnp.float32) for f in feats], axis=1)
    x = jnp.pad(x, ((0, 0), (0, k_pad - x.shape[1]))).astype(jnp.bfloat16)

    w1, b1, w2, b2 = packed["w1"], packed["b1"], packed["w2"], packed["b2"]

    out_shape = [jax.ShapeDtypeStruct((num_modalities, B, E), jnp.float32)]
    out_specs = [pl.BlockSpec((num_modalities, B, E), lambda i: (0, 0, 0))]
    if compute_loss:
        out_shape.append(jax.ShapeDtypeStruct((1, 1), jnp.float32))
        out_specs.append(pl.BlockSpec((1, 1), lambda i: (0, 0),
                                      memory_space=pltpu.MemorySpace.SMEM))

    kernel = functools.partial(
        _fused_kernel, num_modalities=num_modalities, emb_dim=E,
        compute_loss=compute_loss, temperature=temperature)

    result = pl.pallas_call(
        kernel,
        grid=(1,),
        in_specs=[
            pl.BlockSpec(x.shape, lambda i: (0, 0)),
            pl.BlockSpec(w1.shape, lambda i: (0, 0)),
            pl.BlockSpec(b1.shape, lambda i: (0, 0)),
            pl.BlockSpec(w2.shape, lambda i: (0, 0)),
            pl.BlockSpec(b2.shape, lambda i: (0, 0)),
        ],
        out_specs=tuple(out_specs) if compute_loss else out_specs[0],
        out_shape=tuple(out_shape) if compute_loss else out_shape[0],
        compiler_params=pltpu.CompilerParams(dimension_semantics=("arbitrary",)),
    )(x, w1, b1, w2, b2)

    if compute_loss:
        emb, loss = result
        return emb, loss[0, 0]
    return result, None


# ----------------------------- Model wrapper (glue) ----------------------------------

class CrossModalModelPallas:
    """JAX/Pallas port of CrossModalModel with simple deterministic synthetic encoders."""

    def __init__(self, key, *, vocab_size=100, seq_len=16, audio_in=64,
                 image_in=3 * 16 * 16, text_dim=64, audio_dim=96, image_dim=128,
                 embedding_dim=128):
        self.embedding_dim = embedding_dim
        ks = jax.random.split(key, 6)
        scale = 0.02
        # synthetic encoders (plain-JAX glue; injected deps, not part of CrossModalModel)
        self.text_embed = jax.random.normal(ks[0], (vocab_size, text_dim), jnp.float32) * scale
        self.audio_w = jax.random.normal(ks[1], (audio_in, audio_dim), jnp.float32) * scale
        self.audio_b = jnp.zeros((audio_dim,), jnp.float32)
        self.image_w = jax.random.normal(ks[2], (image_in, image_dim), jnp.float32) * scale
        self.image_b = jnp.zeros((image_dim,), jnp.float32)
        # projection heads (the module's own parameters), kept in f32 for reference use
        self.text_proj = self._init_projection(ks[3], text_dim, embedding_dim)
        self.audio_proj = self._init_projection(ks[4], audio_dim, embedding_dim)
        self.image_proj = self._init_projection(ks[5], image_dim, embedding_dim)
        self._proj_params = {"text": self.text_proj, "audio": self.audio_proj,
                             "image": self.image_proj}
        # precompute packed (block-diagonal, padded, bf16) params for the common subsets
        self._packed_cache = {}
        self._pack(("text", "audio", "image"))
        self._pack(("text",)); self._pack(("audio",)); self._pack(("image",))

    @staticmethod
    def _init_projection(key, in_dim, out_dim):
        k1, k2, k3, k4 = jax.random.split(key, 4)
        w1 = jax.random.normal(k1, (in_dim, out_dim), jnp.float32) * 0.02
        b1 = jax.random.normal(k2, (1, out_dim), jnp.float32) * 0.02
        w2 = jax.random.normal(k3, (out_dim, out_dim), jnp.float32) * 0.02
        b2 = jax.random.normal(k4, (1, out_dim), jnp.float32) * 0.02
        return (w1, b1, w2, b2)

    # --- pack per-modality projections into block-diagonal bf16 weights (cached) ------
    def _pack(self, names):
        key = tuple(names)
        if key in self._packed_cache:
            return self._packed_cache[key]
        params = [self._proj_params[n] for n in names]
        E = self.embedding_dim
        N = len(params)
        ks = [p[0].shape[0] for p in params]
        k_total = sum(ks)
        k_pad = max(128, ((k_total + 127) // 128) * 128)

        w1_big = jnp.zeros((k_pad, N * E), jnp.float32)
        off = 0
        for m, (w1, _, _, _) in enumerate(params):
            w1_big = w1_big.at[off:off + ks[m], m * E:(m + 1) * E].set(w1)
            off += ks[m]
        w2_big = jnp.zeros((N * E, N * E), jnp.float32)
        for m, (_, _, w2, _) in enumerate(params):
            w2_big = w2_big.at[m * E:(m + 1) * E, m * E:(m + 1) * E].set(w2)
        b1_big = jnp.concatenate([p[1] for p in params], axis=1)   # (1, N*E)
        b2_big = jnp.concatenate([p[3] for p in params], axis=1)   # (1, N*E)

        packed = dict(w1=w1_big.astype(jnp.bfloat16), b1=b1_big,
                      w2=w2_big.astype(jnp.bfloat16), b2=b2_big,
                      k_pad=k_pad, emb_dim=E)
        self._packed_cache[key] = packed
        return packed

    # --- encoders (plain JAX glue; embedding gather / mean-pool are not kernel work) ---
    def _text_features(self, input_ids, attention_mask=None):
        emb = self.text_embed[input_ids]  # (B, S, text_dim)
        if attention_mask is not None:
            m = attention_mask[..., None].astype(jnp.float32)
            return (emb * m).sum(axis=1) / jnp.maximum(m.sum(axis=1), 1.0)
        return emb.mean(axis=1)

    def _audio_features(self, input_values):
        return input_values.astype(jnp.float32) @ self.audio_w + self.audio_b

    def _image_features(self, pixel_values):
        flat = pixel_values.reshape(pixel_values.shape[0], -1).astype(jnp.float32)
        return flat @ self.image_w + self.image_b

    # --- single-modality encode_* (same fused kernel, N=1, no loss) ---
    def encode_text(self, input_ids, attention_mask=None):
        emb, _ = cross_modal_fused([self._text_features(input_ids, attention_mask)],
                                   self._pack(("text",)), compute_loss=False)
        return emb[0]

    def encode_audio(self, input_values):
        emb, _ = cross_modal_fused([self._audio_features(input_values)],
                                   self._pack(("audio",)), compute_loss=False)
        return emb[0]

    def encode_image(self, pixel_values):
        emb, _ = cross_modal_fused([self._image_features(pixel_values)],
                                   self._pack(("image",)), compute_loss=False)
        return emb[0]

    # --- full forward: ONE fused pallas_call for all heads + all pair losses ---
    def __call__(self, input_ids=None, attention_mask=None, input_values=None,
                 pixel_values=None, return_loss=False):
        feats, names, out_keys = [], [], []
        if input_ids is not None:
            feats.append(self._text_features(input_ids, attention_mask))
            names.append("text"); out_keys.append("text_embeddings")
        if input_values is not None:
            feats.append(self._audio_features(input_values))
            names.append("audio"); out_keys.append("audio_embeddings")
        if pixel_values is not None:
            feats.append(self._image_features(pixel_values))
            names.append("image"); out_keys.append("image_embeddings")
        if not feats:
            return {}
        compute_loss = bool(return_loss) and len(feats) > 1
        emb, loss = cross_modal_fused(feats, self._pack(tuple(names)),
                                      compute_loss=compute_loss)
        outputs = {key: emb[i] for i, key in enumerate(out_keys)}
        if compute_loss:
            outputs["loss"] = loss
        return outputs


# ------------------- reference (pure JAX, same bf16-operand numerics) -----------------

def _projection_ref(x, params):
    w1, b1, w2, b2 = params
    h = jnp.dot(x.astype(jnp.bfloat16), w1.astype(jnp.bfloat16),
                preferred_element_type=jnp.float32) + b1
    h = jnp.maximum(h, 0.0)
    y = jnp.dot(h.astype(jnp.bfloat16), w2.astype(jnp.bfloat16),
                preferred_element_type=jnp.float32) + b2
    n = jnp.sqrt(jnp.sum(y * y, axis=-1, keepdims=True))
    return y / jnp.maximum(n, EPS)


def _nce_ref(e1, e2, temperature=TEMPERATURE):
    logits = (e1 @ e2.T) / temperature
    lse_r = jax.scipy.special.logsumexp(logits, axis=1)
    lse_c = jax.scipy.special.logsumexp(logits, axis=0)
    d = jnp.diagonal(logits)
    return 0.5 * (jnp.mean(lse_r - d) + jnp.mean(lse_c - d))


# ----------------------------- main ---------------------------------------------------

if __name__ == "__main__":
    key = jax.random.PRNGKey(0)
    k_model, k_ids, k_audio, k_img = jax.random.split(key, 4)

    B, S = 8, 16
    model = CrossModalModelPallas(k_model)

    input_ids = jax.random.randint(k_ids, (B, S), 0, 100, dtype=jnp.int32)
    attention_mask = jnp.ones((B, S), jnp.int32)
    input_values = jax.random.normal(k_audio, (B, 64), jnp.float32)
    pixel_values = jax.random.normal(k_img, (B, 3, 16, 16), jnp.float32)

    outputs = model(input_ids=input_ids, attention_mask=attention_mask,
                    input_values=input_values, pixel_values=pixel_values,
                    return_loss=True)
    jax.block_until_ready(outputs["loss"])

    # correctness checks against a pure-JAX reference with the same precision contract
    txt_ref = _projection_ref(model._text_features(input_ids, attention_mask), model.text_proj)
    aud_ref = _projection_ref(model._audio_features(input_values), model.audio_proj)
    img_ref = _projection_ref(model._image_features(pixel_values), model.image_proj)
    assert jnp.allclose(outputs["text_embeddings"], txt_ref, rtol=2e-3, atol=2e-3)
    assert jnp.allclose(outputs["audio_embeddings"], aud_ref, rtol=2e-3, atol=2e-3)
    assert jnp.allclose(outputs["image_embeddings"], img_ref, rtol=2e-3, atol=2e-3)
    loss_ref = (_nce_ref(txt_ref, aud_ref)
                + _nce_ref(txt_ref, img_ref)
                + _nce_ref(aud_ref, img_ref)) / 3.0
    assert jnp.allclose(outputs["loss"], loss_ref, rtol=2e-3, atol=2e-3)

    print("KERNEL_OK")
</pallas_src>

<mosaic_0001>
module attributes {stable_mosaic.version = 11 : i64} {
  func.func @_fused_kernel(%arg0: i32, %arg1: memref<8x384xbf16, #tpu.memory_space<vmem>>, %arg2: memref<384x384xbf16, #tpu.memory_space<vmem>>, %arg3: memref<1x384xf32, #tpu.memory_space<vmem>>, %arg4: memref<384x384xbf16, #tpu.memory_space<vmem>>, %arg5: memref<1x384xf32, #tpu.memory_space<vmem>>, %arg6: memref<3x8x128xf32, #tpu.memory_space<vmem>>, %arg7: memref<1x1xf32, #tpu.memory_space<smem>>) attributes {dimension_semantics = [#tpu.dimension_semantics<arbitrary>], iteration_bounds = array<i64: 1>, scalar_prefetch = 0 : i64, scratch_operands = 0 : i64, tpu.core_type = #tpu.core_type<tc>, window_params = [{pipeline_mode = #tpu.pipeline_mode<synchronous>, transform_indices = @transform_0, window_bounds = array<i64: 8, 384>}, {pipeline_mode = #tpu.pipeline_mode<synchronous>, transform_indices = @transform_1, window_bounds = array<i64: 384, 384>}, {pipeline_mode = #tpu.pipeline_mode<synchronous>, transform_indices = @transform_2, window_bounds = array<i64: 1, 384>}, {pipeline_mode = #tpu.pipeline_mode<synchronous>, transform_indices = @transform_3, window_bounds = array<i64: 384, 384>}, {pipeline_mode = #tpu.pipeline_mode<synchronous>, transform_indices = @transform_4, window_bounds = array<i64: 1, 384>}, {pipeline_mode = #tpu.pipeline_mode<synchronous>, transform_indices = @transform_5, window_bounds = array<i64: 3, 8, 128>}, {transform_indices = @transform_6, window_bounds = array<i64: 1, 1>}]} {
    %c0 = arith.constant 0 : index
    %c0_0 = arith.constant 0 : index
    %0 = vector.load %arg1[%c0, %c0_0] : memref<8x384xbf16, #tpu.memory_space<vmem>>, vector<8x384xbf16>
    %c0_1 = arith.constant 0 : index
    %c0_2 = arith.constant 0 : index
    %1 = vector.load %arg2[%c0_1, %c0_2] : memref<384x384xbf16, #tpu.memory_space<vmem>>, vector<384x384xbf16>
    %cst = arith.constant dense<0.000000e+00> : vector<8x384xf32>
    %2 = tpu.matmul %0, %1, %cst {dimension_numbers = #tpu.dot_dimension_numbers<[1], [0], [0], [1], [0, 0, 1, 1], [], []>} : vector<8x384xbf16>, vector<384x384xbf16>, vector<8x384xf32> -> vector<8x384xf32>
    %c0_3 = arith.constant 0 : index
    %c0_4 = arith.constant 0 : index
    %3 = vector.load %arg3[%c0_3, %c0_4] : memref<1x384xf32, #tpu.memory_space<vmem>>, vector<1x384xf32>
    %4 = vector.broadcast %3 : vector<1x384xf32> to vector<8x384xf32>
    %5 = arith.addf %2, %4 : vector<8x384xf32>
    %cst_5 = arith.constant 0.000000e+00 : f32
    %6 = vector.broadcast %cst_5 : f32 to vector<8x384xf32>
    %7 = arith.maximumf %5, %6 : vector<8x384xf32>
    %8 = arith.truncf %7 : vector<8x384xf32> to vector<8x384xbf16>
    %c0_6 = arith.constant 0 : index
    %c0_7 = arith.constant 0 : index
    %9 = vector.load %arg4[%c0_6, %c0_7] : memref<384x384xbf16, #tpu.memory_space<vmem>>, vector<384x384xbf16>
    %cst_8 = arith.constant dense<0.000000e+00> : vector<8x384xf32>
    %10 = tpu.matmul %8, %9, %cst_8 {dimension_numbers = #tpu.dot_dimension_numbers<[1], [0], [0], [1], [0, 0, 1, 1], [], []>} : vector<8x384xbf16>, vector<384x384xbf16>, vector<8x384xf32> -> vector<8x384xf32>
    %c0_9 = arith.constant 0 : index
    %c0_10 = arith.constant 0 : index
    %11 = vector.load %arg5[%c0_9, %c0_10] : memref<1x384xf32, #tpu.memory_space<vmem>>, vector<1x384xf32>
    %12 = vector.broadcast %11 : vector<1x384xf32> to vector<8x384xf32>
    %13 = arith.addf %10, %12 : vector<8x384xf32>
    %14 = vector.extract_strided_slice %13 {offsets = [0, 0], sizes = [8, 128], strides = [1, 1]} : vector<8x384xf32> to vector<8x128xf32>
    %15 = arith.mulf %14, %14 : vector<8x128xf32>
    %cst_11 = arith.constant dense<0.000000e+00> : vector<8xf32>
    %16 = vector.multi_reduction <add>, %15, %cst_11 [1] : vector<8x128xf32> to vector<8xf32>
    %17 = vector.shape_cast %16 : vector<8xf32> to vector<8x1xf32>
    %cst_12 = arith.constant 1.000000e-24 : f32
    %18 = vector.broadcast %cst_12 : f32 to vector<8x1xf32>
    %19 = arith.maximumf %17, %18 : vector<8x1xf32>
    %20 = math.rsqrt %19 : vector<8x1xf32>
    %21 = vector.broadcast %20 : vector<8x1xf32> to vector<8x128xf32>
    %22 = arith.mulf %14, %21 : vector<8x128xf32>
    %c0_13 = arith.constant 0 : index
    %c0_14 = arith.constant 0 : index
    %c0_15 = arith.constant 0 : index
    %23 = vector.load %arg6[%c0_13, %c0_14, %c0_15] : memref<3x8x128xf32, #tpu.memory_space<vmem>>, vector<1x8x128xf32>
    %24 = vector.shape_cast %23 : vector<1x8x128xf32> to vector<8x128xf32>
    %25 = vector.shape_cast %22 : vector<8x128xf32> to vector<1x8x128xf32>
    tpu.vector_store %arg6[%c0_13, %c0_14, %c0_15], %25 {strides = array<i32>} : memref<3x8x128xf32, #tpu.memory_space<vmem>>, vector<1x8x128xf32>,
    %26 = vector.extract_strided_slice %13 {offsets = [0, 128], sizes = [8, 128], strides = [1, 1]} : vector<8x384xf32> to vector<8x128xf32>
    %27 = arith.mulf %26, %26 : vector<8x128xf32>
    %cst_16 = arith.constant dense<0.000000e+00> : vector<8xf32>
    %28 = vector.multi_reduction <add>, %27, %cst_16 [1] : vector<8x128xf32> to vector<8xf32>
    %29 = vector.shape_cast %28 : vector<8xf32> to vector<8x1xf32>
    %cst_17 = arith.constant 1.000000e-24 : f32
    %30 = vector.broadcast %cst_17 : f32 to vector<8x1xf32>
    %31 = arith.maximumf %29, %30 : vector<8x1xf32>
    %32 = math.rsqrt %31 : vector<8x1xf32>
    %33 = vector.broadcast %32 : vector<8x1xf32> to vector<8x128xf32>
    %34 = arith.mulf %26, %33 : vector<8x128xf32>
    %c1 = arith.constant 1 : index
    %c0_18 = arith.constant 0 : index
    %c0_19 = arith.constant 0 : index
    %35 = vector.load %arg6[%c1, %c0_18, %c0_19] : memref<3x8x128xf32, #tpu.memory_space<vmem>>, vector<1x8x128xf32>
    %36 = vector.shape_cast %35 : vector<1x8x128xf32> to vector<8x128xf32>
    %37 = vector.shape_cast %34 : vector<8x128xf32> to vector<1x8x128xf32>
    tpu.vector_store %arg6[%c1, %c0_18, %c0_19], %37 {strides = array<i32>} : memref<3x8x128xf32, #tpu.memory_space<vmem>>, vector<1x8x128xf32>,
    %38 = vector.extract_strided_slice %13 {offsets = [0, 256], sizes = [8, 128], strides = [1, 1]} : vector<8x384xf32> to vector<8x128xf32>
    %39 = arith.mulf %38, %38 : vector<8x128xf32>
    %cst_20 = arith.constant dense<0.000000e+00> : vector<8xf32>
    %40 = vector.multi_reduction <add>, %39, %cst_20 [1] : vector<8x128xf32> to vector<8xf32>
    %41 = vector.shape_cast %40 : vector<8xf32> to vector<8x1xf32>
    %cst_21 = arith.constant 1.000000e-24 : f32
    %42 = vector.broadcast %cst_21 : f32 to vector<8x1xf32>
    %43 = arith.maximumf %41, %42 : vector<8x1xf32>
    %44 = math.rsqrt %43 : vector<8x1xf32>
    %45 = vector.broadcast %44 : vector<8x1xf32> to vector<8x128xf32>
    %46 = arith.mulf %38, %45 : vector<8x128xf32>
    %c2 = arith.constant 2 : index
    %c0_22 = arith.constant 0 : index
    %c0_23 = arith.constant 0 : index
    %47 = vector.load %arg6[%c2, %c0_22, %c0_23] : memref<3x8x128xf32, #tpu.memory_space<vmem>>, vector<1x8x128xf32>
    %48 = vector.shape_cast %47 : vector<1x8x128xf32> to vector<8x128xf32>
    %49 = vector.shape_cast %46 : vector<8x128xf32> to vector<1x8x128xf32>
    tpu.vector_store %arg6[%c2, %c0_22, %c0_23], %49 {strides = array<i32>} : memref<3x8x128xf32, #tpu.memory_space<vmem>>, vector<1x8x128xf32>,
    %50 = tpu.concatenate %22, %34, %46 in 0 : vector<8x128xf32>, vector<8x128xf32>, vector<8x128xf32> -> vector<24x128xf32>
    %cst_24 = arith.constant 14.2857141 : f32
    %51 = vector.broadcast %cst_24 : f32 to vector<24x128xf32>
    %52 = arith.mulf %50, %51 : vector<24x128xf32>
    %cst_25 = arith.constant dense<0.000000e+00> : vector<24x24xf32>
    %53 = tpu.matmul %52, %50, %cst_25 {dimension_numbers = #tpu.dot_dimension_numbers<[1], [1], [0], [0], [0, 0, 1, 0], [], []>} : vector<24x128xf32>, vector<24x128xf32>, vector<24x24xf32> -> vector<24x24xf32>
    %54 = tpu.iota {dimensions = array<i32: 1>} : vector<24x24xi32>
    %55 = tpu.iota {dimensions = array<i32: 0>} : vector<24x1xi32>
    %c0_i32 = arith.constant 0 : i32
    %56 = vector.broadcast %c0_i32 : i32 to vector<24x24xi32>
    %57 = arith.cmpi sge, %54, %56 : vector<24x24xi32>
    %c8_i32 = arith.constant 8 : i32
    %58 = vector.broadcast %c8_i32 : i32 to vector<24x24xi32>
    %59 = arith.cmpi slt, %54, %58 : vector<24x24xi32>
    %60 = arith.andi %57, %59 : vector<24x24xi1>
    %cst_26 = arith.constant -1.000000e+30 : f32
    %61 = vector.broadcast %cst_26 : f32 to vector<24x24xf32>
    %62 = arith.select %60, %53, %61 : vector<24x24xi1>, vector<24x24xf32>
    %cst_27 = arith.constant dense<0xFF800000> : vector<24xf32>
    %63 = vector.multi_reduction <maximumf>, %62, %cst_27 [1] : vector<24x24xf32> to vector<24xf32>
    %64 = vector.shape_cast %63 : vector<24xf32> to vector<24x1xf32>
    %65 = vector.broadcast %64 : vector<24x1xf32> to vector<24x24xf32>
    %66 = arith.subf %62, %65 : vector<24x24xf32>
    %67 = math.exp %66 : vector<24x24xf32>
    %cst_28 = arith.constant dense<0.000000e+00> : vector<24xf32>
    %68 = vector.multi_reduction <add>, %67, %cst_28 [1] : vector<24x24xf32> to vector<24xf32>
    %69 = vector.shape_cast %68 : vector<24xf32> to vector<24x1xf32>
    %70 = math.log %69 : vector<24x1xf32>
    %71 = arith.addf %64, %70 : vector<24x1xf32>
    %c0_i32_29 = arith.constant 0 : i32
    %72 = vector.broadcast %c0_i32_29 : i32 to vector<24x1xi32>
    %73 = arith.cmpi sge, %55, %72 : vector<24x1xi32>
    %c8_i32_30 = arith.constant 8 : i32
    %74 = vector.broadcast %c8_i32_30 : i32 to vector<24x1xi32>
    %75 = arith.cmpi slt, %55, %74 : vector<24x1xi32>
    %76 = arith.andi %73, %75 : vector<24x1xi1>
    %cst_31 = arith.constant 0.000000e+00 : f32
    %77 = vector.broadcast %cst_31 : f32 to vector<24x1xf32>
    %78 = arith.select %76, %77, %71 : vector<24x1xi1>, vector<24x1xf32>
    %79 = vector.shape_cast %78 : vector<24x1xf32> to vector<1x24x1xf32>
    %cst_32 = arith.constant dense<0.000000e+00> : vector<1xf32>
    %80 = vector.multi_reduction <add>, %79, %cst_32 [1, 2] : vector<1x24x1xf32> to vector<1xf32>
    %81 = vector.shape_cast %80 : vector<1xf32> to vector<1x1x1xf32>
    %82 = vector.extract %81[0, 0, 0] : f32 from vector<1x1x1xf32>
    %cst_33 = arith.constant 0.000000e+00 : f32
    %83 = arith.addf %cst_33, %82 : f32
    %c8_i32_34 = arith.constant 8 : i32
    %84 = vector.broadcast %c8_i32_34 : i32 to vector<24x24xi32>
    %85 = arith.cmpi sge, %54, %84 : vector<24x24xi32>
    %c16_i32 = arith.constant 16 : i32
    %86 = vector.broadcast %c16_i32 : i32 to vector<24x24xi32>
    %87 = arith.cmpi slt, %54, %86 : vector<24x24xi32>
    %88 = arith.andi %85, %87 : vector<24x24xi1>
    %cst_35 = arith.constant -1.000000e+30 : f32
    %89 = vector.broadcast %cst_35 : f32 to vector<24x24xf32>
    %90 = arith.select %88, %53, %89 : vector<24x24xi1>, vector<24x24xf32>
    %cst_36 = arith.constant dense<0xFF800000> : vector<24xf32>
    %91 = vector.multi_reduction <maximumf>, %90, %cst_36 [1] : vector<24x24xf32> to vector<24xf32>
    %92 = vector.shape_cast %91 : vector<24xf32> to vector<24x1xf32>
    %93 = vector.broadcast %92 : vector<24x1xf32> to vector<24x24xf32>
    %94 = arith.subf %90, %93 : vector<24x24xf32>
    %95 = math.exp %94 : vector<24x24xf32>
    %cst_37 = arith.constant dense<0.000000e+00> : vector<24xf32>
    %96 = vector.multi_reduction <add>, %95, %cst_37 [1] : vector<24x24xf32> to vector<24xf32>
    %97 = vector.shape_cast %96 : vector<24xf32> to vector<24x1xf32>
    %98 = math.log %97 : vector<24x1xf32>
    %99 = arith.addf %92, %98 : vector<24x1xf32>
    %c8_i32_38 = arith.constant 8 : i32
    %100 = vector.broadcast %c8_i32_38 : i32 to vector<24x1xi32>
    %101 = arith.cmpi sge, %55, %100 : vector<24x1xi32>
    %c16_i32_39 = arith.constant 16 : i32
    %102 = vector.broadcast %c16_i32_39 : i32 to vector<24x1xi32>
    %103 = arith.cmpi slt, %55, %102 : vector<24x1xi32>
    %104 = arith.andi %101, %103 : vector<24x1xi1>
    %cst_40 = arith.constant 0.000000e+00 : f32
    %105 = vector.broadcast %cst_40 : f32 to vector<24x1xf32>
    %106 = arith.select %104, %105, %99 : vector<24x1xi1>, vector<24x1xf32>
    %107 = vector.shape_cast %106 : vector<24x1xf32> to vector<1x24x1xf32>
    %cst_41 = arith.constant dense<0.000000e+00> : vector<1xf32>
    %108 = vector.multi_reduction <add>, %107, %cst_41 [1, 2] : vector<1x24x1xf32> to vector<1xf32>
    %109 = vector.shape_cast %108 : vector<1xf32> to vector<1x1x1xf32>
    %110 = vector.extract %109[0, 0, 0] : f32 from vector<1x1x1xf32>
    %111 = arith.addf %83, %110 : f32
    %c16_i32_42 = arith.constant 16 : i32
    %112 = vector.broadcast %c16_i32_42 : i32 to vector<24x24xi32>
    %113 = arith.cmpi sge, %54, %112 : vector<24x24xi32>
    %c24_i32 = arith.constant 24 : i32
    %114 = vector.broadcast %c24_i32 : i32 to vector<24x24xi32>
    %115 = arith.cmpi slt, %54, %114 : vector<24x24xi32>
    %116 = arith.andi %113, %115 : vector<24x24xi1>
    %cst_43 = arith.constant -1.000000e+30 : f32
    %117 = vector.broadcast %cst_43 : f32 to vector<24x24xf32>
    %118 = arith.select %116, %53, %117 : vector<24x24xi1>, vector<24x24xf32>
    %cst_44 = arith.constant dense<0xFF800000> : vector<24xf32>
    %119 = vector.multi_reduction <maximumf>, %118, %cst_44 [1] : vector<24x24xf32> to vector<24xf32>
    %120 = vector.shape_cast %119 : vector<24xf32> to vector<24x1xf32>
    %121 = vector.broadcast %120 : vector<24x1xf32> to vector<24x24xf32>
    %122 = arith.subf %118, %121 : vector<24x24xf32>
    %123 = math.exp %122 : vector<24x24xf32>
    %cst_45 = arith.constant dense<0.000000e+00> : vector<24xf32>
    %124 = vector.multi_reduction <add>, %123, %cst_45 [1] : vector<24x24xf32> to vector<24xf32>
    %125 = vector.shape_cast %124 : vector<24xf32> to vector<24x1xf32>
    %126 = math.log %125 : vector<24x1xf32>
    %127 = arith.addf %120, %126 : vector<24x1xf32>
    %c16_i32_46 = arith.constant 16 : i32
    %128 = vector.broadcast %c16_i32_46 : i32 to vector<24x1xi32>
    %129 = arith.cmpi sge, %55, %128 : vector<24x1xi32>
    %c24_i32_47 = arith.constant 24 : i32
    %130 = vector.broadcast %c24_i32_47 : i32 to vector<24x1xi32>
    %131 = arith.cmpi slt, %55, %130 : vector<24x1xi32>
    %132 = arith.andi %129, %131 : vector<24x1xi1>
    %cst_48 = arith.constant 0.000000e+00 : f32
    %133 = vector.broadcast %cst_48 : f32 to vector<24x1xf32>
    %134 = arith.select %132, %133, %127 : vector<24x1xi1>, vector<24x1xf32>
    %135 = vector.shape_cast %134 : vector<24x1xf32> to vector<1x24x1xf32>
    %cst_49 = arith.constant dense<0.000000e+00> : vector<1xf32>
    %136 = vector.multi_reduction <add>, %135, %cst_49 [1, 2] : vector<1x24x1xf32> to vector<1xf32>
    %137 = vector.shape_cast %136 : vector<1xf32> to vector<1x1x1xf32>
    %138 = vector.extract %137[0, 0, 0] : f32 from vector<1x1x1xf32>
    %139 = arith.addf %111, %138 : f32
    %140 = arith.mulf %22, %34 : vector<8x128xf32>
    %141 = vector.shape_cast %140 : vector<8x128xf32> to vector<1x8x128xf32>
    %cst_50 = arith.constant dense<0.000000e+00> : vector<1xf32>
    %142 = vector.multi_reduction <add>, %141, %cst_50 [1, 2] : vector<1x8x128xf32> to vector<1xf32>
    %143 = vector.shape_cast %142 : vector<1xf32> to vector<1x1x1xf32>
    %144 = vector.extract %143[0, 0, 0] : f32 from vector<1x1x1xf32>
    %cst_51 = arith.constant 0.000000e+00 : f32
    %145 = arith.addf %cst_51, %144 : f32
    %146 = arith.mulf %22, %46 : vector<8x128xf32>
    %147 = vector.shape_cast %146 : vector<8x128xf32> to vector<1x8x128xf32>
    %cst_52 = arith.constant dense<0.000000e+00> : vector<1xf32>
    %148 = vector.multi_reduction <add>, %147, %cst_52 [1, 2] : vector<1x8x128xf32> to vector<1xf32>
    %149 = vector.shape_cast %148 : vector<1xf32> to vector<1x1x1xf32>
    %150 = vector.extract %149[0, 0, 0] : f32 from vector<1x1x1xf32>
    %151 = arith.addf %145, %150 : f32
    %152 = arith.mulf %34, %46 : vector<8x128xf32>
    %153 = vector.shape_cast %152 : vector<8x128xf32> to vector<1x8x128xf32>
    %cst_53 = arith.constant dense<0.000000e+00> : vector<1xf32>
    %154 = vector.multi_reduction <add>, %153, %cst_53 [1, 2] : vector<1x8x128xf32> to vector<1xf32>
    %155 = vector.shape_cast %154 : vector<1xf32> to vector<1x1x1xf32>
    %156 = vector.extract %155[0, 0, 0] : f32 from vector<1x1x1xf32>
    %157 = arith.addf %151, %156 : f32
    %cst_54 = arith.constant 2.000000e+00 : f32
    %cst_55 = arith.constant 14.2857141 : f32
    %158 = arith.mulf %cst_54, %cst_55 : f32
    %159 = arith.mulf %158, %157 : f32
    %160 = arith.subf %139, %159 : f32
    %cst_56 = arith.constant 4.800000e+01 : f32
    %161 = arith.divf %160, %cst_56 : f32
    %c0_57 = arith.constant 0 : index
    %c0_58 = arith.constant 0 : index
    %162 = memref.load %arg7[%c0_57, %c0_58] : memref<1x1xf32, #tpu.memory_space<smem>>
    memref.store %161, %arg7[%c0_57, %c0_58] : memref<1x1xf32, #tpu.memory_space<smem>>
    return
  }
  func.func @transform_0(%arg0: i32) -> (i32, i32) {
    %c0_i32 = arith.constant 0 : i32
    %c0_i32_0 = arith.constant 0 : i32
    %c0_i32_1 = arith.constant 0 : i32
    return %c0_i32, %c0_i32_0 : i32, i32
  }
  func.func @transform_1(%arg0: i32) -> (i32, i32) {
    %c0_i32 = arith.constant 0 : i32
    %c0_i32_0 = arith.constant 0 : i32
    %c0_i32_1 = arith.constant 0 : i32
    return %c0_i32, %c0_i32_0 : i32, i32
  }
  func.func @transform_2(%arg0: i32) -> (i32, i32) {
    %c0_i32 = arith.constant 0 : i32
    %c0_i32_0 = arith.constant 0 : i32
    %c0_i32_1 = arith.constant 0 : i32
    return %c0_i32, %c0_i32_0 : i32, i32
  }
  func.func @transform_3(%arg0: i32) -> (i32, i32) {
    %c0_i32 = arith.constant 0 : i32
    %c0_i32_0 = arith.constant 0 : i32
    %c0_i32_1 = arith.constant 0 : i32
    return %c0_i32, %c0_i32_0 : i32, i32
  }
  func.func @transform_4(%arg0: i32) -> (i32, i32) {
    %c0_i32 = arith.constant 0 : i32
    %c0_i32_0 = arith.constant 0 : i32
    %c0_i32_1 = arith.constant 0 : i32
    return %c0_i32, %c0_i32_0 : i32, i32
  }
  func.func @transform_5(%arg0: i32) -> (i32, i32, i32) {
    %c0_i32 = arith.constant 0 : i32
    %c0_i32_0 = arith.constant 0 : i32
    %c0_i32_1 = arith.constant 0 : i32
    %c0_i32_2 = arith.constant 0 : i32
    return %c0_i32, %c0_i32_0, %c0_i32_1 : i32, i32, i32
  }
  func.func @transform_6(%arg0: i32) -> (i32, i32) {
    %c0_i32 = arith.constant 0 : i32
    %c0_i32_0 = arith.constant 0 : i32
    %c0_i32_1 = arith.constant 0 : i32
    return %c0_i32, %c0_i32_0 : i32, i32
  }
}

</mosaic_0001>

<bundles_post_ra>
// kernel: tpu_custom_call.1
= control target key start
LH: loop header
LB: loop body
LE: loop exit
PB: predicated region body
PF: predicated region fallthrough
CT: control target
= control target key end

     0   :  { %12 = vsyncpa [#allocation3], 0  ;;  %s2588_s0 = inlined_call_operand.hbm [shape: bf16[8,384], index: 0, kind: input, shape index: {}]   ;;  %s2589_s1 = inlined_call_operand.hbm [shape: bf16[384,384], index: 1, kind: input, shape index: {}]   ;;  %s2590_s2 = inlined_call_operand.vmem [shape: f32[1,384], index: 2, kind: input, shape index: {}]   ;;  %s2591_s3 = inlined_call_operand.hbm [shape: bf16[384,384], index: 3, kind: input, shape index: {}]   ;;  %s2592_s4 = inlined_call_operand.vmem [shape: f32[1,384], index: 4, kind: input, shape index: {}]   ;;  %s2593_s5 = inlined_call_operand.hbm [shape: f32[3,8,128], index: 5, kind: output, shape index: {0}]   ;;  %s2594_s6 = inlined_call_operand.hbm [shape: f32[1,1], index: 6, kind: output, shape index: {1}]  }
   0x1   :  { %13 = vsyncpa [#allocation7], 0 }
   0x2   :  { %14 = vsyncpa [#allocation4], 0 }
   0x3   :  { %15 = vsyncpa [#allocation5], 0  ;;  %s2414_s21 = smov [#allocation6]  }
   0x4   :  { %s31_s22 = sshll.u32 %s2414_s21, 4  ;;  %s32_s22 = int_to_ptr.vmem [resolvable:$true] %s31_s22 }
   0x5   :  { %s2326_s23 = scalar_lea.vmem %s32_s22, 9216  ;;  %p2331_p1 = scmp.lt.s32.totalorder %s32_s22, %s32_s22 }
   0x6   :  { %p2327_p0 = scmp.ne.s32.totalorder %s32_s22, %s2326_s23  ;;  %p2332_p2 = scmp.lt.s32.totalorder %s2326_s23, %s2326_s23 }
   0x8   :  { %p2333_p3 = por %p2332_p2, %p2331_p1 }
   0xa   :  { %p2334_p4 = pnand %p2333_p3, %p2327_p0 }
   0xc   :  { %2337 = shalt.err (!%p2334_p4)
}
   0xd   :  { %s2415_s24 = smov 192   ;;  %s2416_s25 = smov 12  }
   0xe   :  { %37 = dma.hbm_to_vmem [thread:$0]  %s2589_s1, 9216, %s32_s22, [#allocation7], %s2415_s24, %s2415_s24, %s2416_s25  }
   0xf   :  { %s2417_s28 = smov [#allocation2]   ;;  %s2418_s30 = smov [#allocation8]  }
  0x10   :  { %s22_s29 = sshll.u32 %s2417_s28, 4  ;;  %s45_s7 = sshll.u32 %s2418_s30, 4  ;;  %s23_s29 = int_to_ptr.vmem [resolvable:$true] %s22_s29  ;;  %s46_s7 = int_to_ptr.vmem [resolvable:$true] %s45_s7 }
  0x11   :  { %s2346_s8 = scalar_lea.vmem %s23_s29, 192  ;;  %p2351_p6 = scmp.lt.s32.totalorder %s23_s29, %s23_s29 }
  0x12   :  { %p2347_p5 = scmp.ne.s32.totalorder %s23_s29, %s2346_s8  ;;  %p2352_p7 = scmp.lt.s32.totalorder %s2346_s8, %s2346_s8 }
  0x14   :  { %p2353_p8 = por %p2352_p7, %p2351_p6 }
  0x16   :  { %p2354_p9 = pnand %p2353_p8, %p2347_p5 }
  0x18   :  { %2357 = shalt.err (!%p2354_p9)
}
  0x19   :  { %25 = dma.hbm_to_vmem [thread:$0]  %s2588_s0, 192, %s23_s29, [#allocation3]  }
  0x1a   :  { %s2366_s11 = scalar_lea.vmem %s46_s7, 9216  ;;  %p2371_p11 = scmp.lt.s32.totalorder %s46_s7, %s46_s7 }
  0x1b   :  { %p2367_p10 = scmp.ne.s32.totalorder %s46_s7, %s2366_s11  ;;  %p2372_p12 = scmp.lt.s32.totalorder %s2366_s11, %s2366_s11 }
  0x1d   :  { %p2373_p13 = por %p2372_p12, %p2371_p11 }
  0x1f   :  { %p2374_p0 = pnand %p2373_p13, %p2367_p10 }
  0x21   :  { %2377 = shalt.err (!%p2374_p0)
}
  0x22   :  { %51 = dma.hbm_to_vmem [thread:$0]  %s2591_s3, 9216, %s46_s7, [#allocation7], %s2415_s24, %s2415_s24, %s2416_s25  }
  0x23   :  { %2406 = dma.done.wait [#allocation3], 192  }
  0x24   :  { %2407 = vsyncadd [#allocation3], 4294967104 }
  0x25   :  { %2408 = dma.done.wait [#allocation7], 18432  }
  0x26   :  { %2409 = vsyncadd [#allocation7], 4294948864  ;;  %v2419_v0 = vmov 0   ;;  %v2093_v1 = vld [vmem:[#allocation6 + $0xac] ss:$12 sps:$4 sm:$0xff]   ;;  %vm2421_vm0 = vmmov 0  }
  0x27   :  { %647 = vmatprep.mubr.bf16.mxu1 %v2419_v0  ;;  %v2095_v2 = vld [vmem:[#allocation6 + $0xa8] ss:$12 sps:$4 sm:$0xff]   ;;  %574 = vmatprep.subr.bf16.mxu0 %v2093_v1  ;;  %v2098_v4 = vld [vmem:[#allocation6 + $0x90] ss:$12 sps:$4 sm:$0xff]   ;;  %v2101_v6 = vld [vmem:[#allocation6 + $0x78] ss:$12 sps:$4 sm:$0xff]  }
  0x28   :  { %v2096_v3 = vld [vmem:[#allocation6 + $0x94] ss:$12 sps:$4 sm:$0xff]   ;;  %575 = vmatpush1.bf16.msra.mxu0 %v2095_v2  ;;  %v2099_v5 = vld [vmem:[#allocation6 + $0x7c] ss:$12 sps:$4 sm:$0xff]   ;;  %v2102_v7 = vld [vmem:[#allocation6 + $0x64] ss:$12 sps:$4 sm:$0xff]  }
  0x29   :  { %576 = vmatprep.subr.bf16.mxu0 %v2096_v3  ;;  %v2110_v8 = vld [vmem:[#allocation6 + $0x22c] ss:$12 sps:$4 sm:$0xff]   ;;  %v2113_v9 = vld [vmem:[#allocation6 + $0x228] ss:$12 sps:$4 sm:$0xff]   ;;  %v2119_v12 = vld [vmem:[#allocation6 + $0x210] ss:$12 sps:$4 sm:$0xff]  }
  0x2a   :  { %615 = vmatprep.subr.bf16.mxu1 %v2110_v8  ;;  %v2104_v10 = vld [vmem:[#allocation6 + $0x60] ss:$12 sps:$4 sm:$0xff]   ;;  %v2122_v14 = vld [vmem:[#allocation6 + $0x1fc] ss:$12 sps:$4 sm:$0xff]   ;;  %v2125_v16 = vld [vmem:[#allocation6 + $0x1f8] ss:$12 sps:$4 sm:$0xff]  }
  0x2b   :  { %616 = vmatpush1.bf16.msra.mxu1 %v2113_v9  ;;  %v2116_v11 = vld [vmem:[#allocation6 + $0x214] ss:$12 sps:$4 sm:$0xff]   ;;  %v2105_v13 = vld [vmem:[#allocation6 + $0x4c] ss:$12 sps:$4 sm:$0xff]   ;;  %v2128_v18 = vld [vmem:[#allocation6 + $0x1e4] ss:$12 sps:$4 sm:$0xff]  }
  0x2c   :  { %577 = vmatpush1.bf16.msra.mxu0 %v2098_v4  ;;  %617 = vmatprep.subr.bf16.mxu1 %v2116_v11  ;;  %v2107_v15 = vld [vmem:[#allocation6 + $0x48] ss:$12 sps:$4 sm:$0xff]   ;;  %v2112_v19 = vld [vmem:[#allocation6 + $0x30] ss:$12 sps:$4 sm:$0xff]   ;;  %v2131_v21 = vld [vmem:[#allocation6 + $0x1e0] ss:$12 sps:$4 sm:$0xff]  }
  0x2d   :  { %578 = vmatprep.subr.bf16.mxu0 %v2099_v5  ;;  %v2108_v17 = vld [vmem:[#allocation6 + $0x34] ss:$12 sps:$4 sm:$0xff]   ;;  %v2114_v20 = vld [vmem:[#allocation6 + $0x1c] ss:$12 sps:$4 sm:$0xff]   ;;  %v2134_v22 = vld [vmem:[#allocation6 + $0x1cc] ss:$12 sps:$4 sm:$0xff]  }
  0x2e   :  { %v2118_v23 = vld [vmem:[#allocation6 + $0x18] ss:$12 sps:$4 sm:$0xff]   ;;  %v2137_v24 = vld [vmem:[#allocation6 + $0x1c8] ss:$12 sps:$4 sm:$0xff]   ;;  %v2124_v27 = vld [vmem:[#allocation6] ss:$12 sps:$4 sm:$0xff]  }
  0x2f   :  { %618 = vmatpush1.bf16.msra.mxu1 %v2119_v12  ;;  %v2120_v25 = vld [vmem:[#allocation6 + $0x4] ss:$12 sps:$4 sm:$0xff]   ;;  %v2140_v26 = vld [vmem:[#allocation6 + $0x1b4] ss:$12 sps:$4 sm:$0xff]   ;;  %v2126_v28 = vld [vmem:[#allocation6 + $0x16c] ss:$12 sps:$4 sm:$0xff]  }
  0x30   :  { %579 = vmatpush1.bf16.msra.mxu0 %v2101_v6  ;;  %619 = vmatprep.subr.bf16.mxu1 %v2122_v14  ;;  %v2143_v29 = vld [vmem:[#allocation6 + $0x1b0] ss:$12 sps:$4 sm:$0xff]   ;;  %v2130_v31 = vld [vmem:[#allocation6 + $0x168] ss:$12 sps:$4 sm:$0xff]   ;;  %v2149_v33 = vld [vmem:[#allocation6 + $0x198] ss:$12 sps:$4 sm:$0xff]  }
  0x31   :  { %580 = vmatprep.subr.bf16.mxu0 %v2102_v7  ;;  %v2146_v30 = vld [vmem:[#allocation6 + $0x19c] ss:$12 sps:$4 sm:$0xff]   ;;  %v2132_v32 = vld [vmem:[#allocation6 + $0x154] ss:$12 sps:$4 sm:$0xff]   ;;  %v2152_v34 = vld [vmem:[#allocation6 + $0x184] ss:$12 sps:$4 sm:$0xff]  }
  0x32   :  { %v2136_v35 = vld [vmem:[#allocation6 + $0x150] ss:$12 sps:$4 sm:$0xff]   ;;  %v2155_v37 = vld [vmem:[#allocation6 + $0x180] ss:$12 sps:$4 sm:$0xff]   ;;  %v2142_v39 = vld [vmem:[#allocation6 + $0x138] ss:$12 sps:$4 sm:$0xff]  }
  0x33   :  { %620 = vmatpush1.bf16.msra.mxu1 %v2125_v16  ;;  %v2138_v36 = vld [vmem:[#allocation6 + $0x13c] ss:$12 sps:$4 sm:$0xff]   ;;  %v2144_v40 = vld [vmem:[#allocation6 + $0x124] ss:$12 sps:$4 sm:$0xff]   ;;  %v64_v42 = vld [vmem:[#allocation2] sm:$0xff]  ;;  %v2420_v5 = vmov 0.0  }
  0x34   :  { %581 = vmatpush1.bf16.msra.mxu0 %v2104_v10  ;;  %621 = vmatprep.subr.bf16.mxu1 %v2128_v18  ;;  %v2158_v38 = vld [vmem:[#allocation6 + $0x170] ss:$12 sps:$4 sm:$0xff]   ;;  %v1794_v44 = vcombine.high %v64_v42, %v64_v42  ;;  %v2164_v45 = vld [vmem:[#allocation6 + $0x158] ss:$12 sps:$4 sm:$0xff]   ;;  %v2148_v46 = vld [vmem:[#allocation6 + $0x120] ss:$12 sps:$4 sm:$0xff]   ;;  %v1793_v2 = vcombine.low %v64_v42, %v64_v42 }
  0x35   :  { %582 = vmatprep.subr.bf16.mxu0 %v2105_v13  ;;  %v2471_v41 = vld [vmem:[#allocation2 + $0x8] ss:$0 sps:$4 sm:$0xff]   ;;  %v2150_v47 = vld [vmem:[#allocation6 + $0x10c] ss:$12 sps:$4 sm:$0xff]   ;;  %v2154_v50 = vld [vmem:[#allocation6 + $0x108] ss:$12 sps:$4 sm:$0xff]  }
  0x36   :  { %v2161_v43 = vld [vmem:[#allocation6 + $0xb0] ss:$12 sps:$4 sm:$0xff]   ;;  %606 = vmatprep.mubr.bf16.mxu0 %v1794_v44  ;;  %v2166_v48 = vld [vmem:[#allocation6 + $0x98] ss:$12 sps:$4 sm:$0xff]   ;;  %v2169_v49 = vld [vmem:[#allocation6 + $0x140] ss:$12 sps:$4 sm:$0xff]  }
  0x37   :  { %622 = vmatpush1.bf16.msra.mxu1 %v2131_v21  ;;  %v2156_v51 = vld [vmem:[#allocation6 + $0xf4] ss:$12 sps:$4 sm:$0xff]   ;;  %v2159_v54 = vld [vmem:[#allocation6 + $0xf0] ss:$12 sps:$4 sm:$0xff]   ;;  %v2165_v58 = vld [vmem:[#allocation6 + $0xd8] ss:$12 sps:$4 sm:$0xff]  }
  0x38   :  { %583 = vmatpush1.bf16.msra.mxu0 %v2107_v15  ;;  %623 = vmatprep.subr.bf16.mxu1 %v2134_v22  ;;  %v2171_v52 = vld [vmem:[#allocation6 + $0x80] ss:$12 sps:$4 sm:$0xff]   ;;  %v2174_v53 = vld [vmem:[#allocation6 + $0x128] ss:$12 sps:$4 sm:$0xff]   ;;  %v2177_v57 = vld [vmem:[#allocation6 + $0x110] ss:$12 sps:$4 sm:$0xff]  }
  0x39   :  { %584 = vmatprep.subr.bf16.mxu0 %v2108_v17  ;;  %v2162_v55 = vld [vmem:[#allocation6 + $0xdc] ss:$12 sps:$4 sm:$0xff]   ;;  %v2167_v59 = vld [vmem:[#allocation6 + $0xc4] ss:$12 sps:$4 sm:$0xff]   ;;  %v2170_v62 = vld [vmem:[#allocation6 + $0xc0] ss:$12 sps:$4 sm:$0xff]  }
  0x3a   :  { %v2175_v56 = vld [vmem:[#allocation6 + $0x68] ss:$12 sps:$4 sm:$0xff]   ;;  %v2178_v60 = vld [vmem:[#allocation6 + $0x50] ss:$12 sps:$4 sm:$0xff]   ;;  %v2180_v61 = vld [vmem:[#allocation6 + $0xf8] ss:$12 sps:$4 sm:$0xff]  }
  0x3b   :  { %624 = vmatpush1.bf16.msra.mxu1 %v2137_v24  ;;  %v2181_v63 = vld [vmem:[#allocation6 + $0x38] ss:$12 sps:$4 sm:$0xff]   ;;  %v2183_v1 = vld [vmem:[#allocation6 + $0xe0] ss:$12 sps:$4 sm:$0xff]   ;;  %v2176_v3 = vld [vmem:[#allocation6 + $0x230] ss:$12 sps:$4 sm:$0xff]  }
  0x3c   :  { %585 = vmatpush1.bf16.msra.mxu0 %v2112_v19  ;;  %625 = vmatprep.subr.bf16.mxu1 %v2140_v26  ;;  %v2184_v4 = vld [vmem:[#allocation6 + $0x20] ss:$12 sps:$4 sm:$0xff]   ;;  %v2186_v6 = vld [vmem:[#allocation6 + $0xc8] ss:$12 sps:$4 sm:$0xff]   ;;  %v2179_v7 = vld [vmem:[#allocation6 + $0x218] ss:$12 sps:$4 sm:$0xff]  }
  0x3d   :  { %586 = vmatprep.subr.bf16.mxu0 %v2114_v20  ;;  %v2187_v8 = vld [vmem:[#allocation6 + $0x8] ss:$12 sps:$4 sm:$0xff]   ;;  %v2194_v9 = vld [vmem:[#allocation8 + $0xac] ss:$12 sps:$4 sm:$0xff]   ;;  %v2195_v14 = vld [vmem:[#allocation8 + $0x90] ss:$12 sps:$4 sm:$0xff]  }
  0x3e   :  { %v2182_v10 = vld [vmem:[#allocation6 + $0x200] ss:$12 sps:$4 sm:$0xff]   ;;  %v2192_v11 = vld [vmem:[#allocation8 + $0xa8] ss:$12 sps:$4 sm:$0xff]   ;;  %v2188_v16 = vld [vmem:[#allocation6 + $0x1d0] ss:$12 sps:$4 sm:$0xff]  }
  0x3f   :  { %626 = vmatpush1.bf16.msra.mxu1 %v2143_v29  ;;  %v2197_v12 = vld [vmem:[#allocation8 + $0x94] ss:$12 sps:$4 sm:$0xff]   ;;  %v2200_v15 = vld [vmem:[#allocation8 + $0x7c] ss:$12 sps:$4 sm:$0xff]   ;;  %v2198_v17 = vld [vmem:[#allocation8 + $0x78] ss:$12 sps:$4 sm:$0xff]  }
  0x40   :  { %587 = vmatpush1.bf16.msra.mxu0 %v2118_v23  ;;  %627 = vmatprep.subr.bf16.mxu1 %v2146_v30  ;;  %v2185_v13 = vld [vmem:[#allocation6 + $0x1e8] ss:$12 sps:$4 sm:$0xff]   ;;  %v2203_v18 = vld [vmem:[#allocation8 + $0x64] ss:$12 sps:$4 sm:$0xff]   ;;  %v2201_v20 = vld [vmem:[#allocation8 + $0x60] ss:$12 sps:$4 sm:$0xff]  }
  0x41   :  { %588 = vmatprep.subr.bf16.mxu0 %v2120_v25  ;;  %v2189_v19 = vld [vmem:[#allocation6 + $0x1b8] ss:$12 sps:$4 sm:$0xff]   ;;  %v2190_v22 = vld [vmem:[#allocation6 + $0x1a0] ss:$12 sps:$4 sm:$0xff]   ;;  %v2204_v23 = vld [vmem:[#allocation8 + $0x48] ss:$12 sps:$4 sm:$0xff]  }
  0x42   :  { %v2206_v21 = vld [vmem:[#allocation8 + $0x4c] ss:$12 sps:$4 sm:$0xff]   ;;  %v2209_v24 = vld [vmem:[#allocation8 + $0x34] ss:$12 sps:$4 sm:$0xff]   ;;  %v2207_v26 = vld [vmem:[#allocation8 + $0x30] ss:$12 sps:$4 sm:$0xff]  }
  0x43   :  { %628 = vmatpush1.bf16.msra.mxu1 %v2149_v33  ;;  %v2191_v25 = vld [vmem:[#allocation6 + $0x188] ss:$12 sps:$4 sm:$0xff]   ;;  %v2215_v29 = vld [vmem:[#allocation8 + $0x4] ss:$12 sps:$4 sm:$0xff]   ;;  %v2213_v30 = vld [vmem:[#allocation8] ss:$12 sps:$4 sm:$0xff]  }
  0x44   :  { %589 = vmatpush1.bf16.msra.mxu0 %v2124_v27  ;;  %629 = vmatprep.subr.bf16.mxu1 %v2152_v34  ;;  %v2212_v27 = vld [vmem:[#allocation8 + $0x1c] ss:$12 sps:$4 sm:$0xff]   ;;  %v2221_v33 = vld [vmem:[#allocation8 + $0x154] ss:$12 sps:$4 sm:$0xff]   ;;  %vm1519_vm4 = vcmask 195584   ;;  %vm1568_vm9 = vcmask 7168  }
  0x45   :  { %590 = vmatprep.subr.bf16.mxu0 %v2126_v28  ;;  %v2210_v28 = vld [vmem:[#allocation8 + $0x18] ss:$12 sps:$4 sm:$0xff]   ;;  %v2219_v34 = vld [vmem:[#allocation8 + $0x150] ss:$12 sps:$4 sm:$0xff]  }
  0x46   :  { %v2236_v42 = vld [vmem:[#allocation8 + $0xdc] ss:$12 sps:$4 sm:$0xff]  }
  0x47   :  { %630 = vmatpush1.bf16.msra.mxu1 %v2155_v37  ;;  %v2227_v37 = vld [vmem:[#allocation8 + $0x124] ss:$12 sps:$4 sm:$0xff]  }
  0x48   :  { %591 = vmatpush2.bf16.msra.mxu0 %v2130_v31  ;;  %1940 = vmatprep.subr.bf16.mxu1 %v2158_v38  ;;  %v2218_v31 = vld [vmem:[#allocation8 + $0x16c] ss:$12 sps:$4 sm:$0xff]  }
  0x49   :  { %592 = vmatprep.subr.bf16.mxu0 %v2132_v32  ;;  %v2216_v32 = vld [vmem:[#allocation8 + $0x168] ss:$12 sps:$4 sm:$0xff]   ;;  %v2225_v38 = vld [vmem:[#allocation8 + $0x120] ss:$12 sps:$4 sm:$0xff]  }
  0x4a   :  { %648 = vmatmul.mubr.bf16.vlgmr.msra.gmra.mxu1 %v2471_v41 }
  0x4b   :  { %1941 = vmatpush3.bf16.msra.mxu1 %v2161_v43  ;;  %688 = vmatprep.mubr.bf16.mxu1 %v1794_v44  ;;  %v2234_v43 = vld [vmem:[#allocation8 + $0xd8] ss:$12 sps:$4 sm:$0xff]  }
  0x4c   :  { %593 = vmatpush2.bf16.msra.mxu0 %v2136_v35  ;;  %1942 = vmatprep.subr.bf16.mxu1 %v2164_v45  ;;  %v2224_v35 = vld [vmem:[#allocation8 + $0x13c] ss:$12 sps:$4 sm:$0xff]   ;;  %v2239_v44 = vld [vmem:[#allocation8 + $0x22c] ss:$12 sps:$4 sm:$0xff]  }
  0x4d   :  { %594 = vmatprep.subr.bf16.mxu0 %v2138_v36  ;;  %v2222_v36 = vld [vmem:[#allocation8 + $0x138] ss:$12 sps:$4 sm:$0xff]   ;;  %v2237_v45 = vld [vmem:[#allocation8 + $0x228] ss:$12 sps:$4 sm:$0xff]  }
  0x4f   :  { %1943 = vmatpush3.bf16.msra.mxu1 %v2166_v48  ;;  %v2245_v48 = vld [vmem:[#allocation8 + $0x214] ss:$12 sps:$4 sm:$0xff]  }
  0x50   :  { %595 = vmatpush2.bf16.msra.mxu0 %v2142_v39  ;;  %1944 = vmatprep.subr.bf16.mxu1 %v2169_v49  ;;  %v2230_v39 = vld [vmem:[#allocation8 + $0x10c] ss:$12 sps:$4 sm:$0xff]   ;;  %v2243_v49 = vld [vmem:[#allocation8 + $0x210] ss:$12 sps:$4 sm:$0xff]  }
  0x51   :  { %596 = vmatprep.subr.bf16.mxu0 %v2144_v40  ;;  %v2233_v40 = vld [vmem:[#allocation8 + $0xf4] ss:$12 sps:$4 sm:$0xff]  }
  0x53   :  { %1945 = vmatpush3.bf16.msra.mxu1 %v2171_v52  ;;  %v2251_v52 = vld [vmem:[#allocation8 + $0x1e0] ss:$12 sps:$4 sm:$0xff]  }
  0x54   :  { %597 = vmatpush2.bf16.msra.mxu0 %v2148_v46  ;;  %1946 = vmatprep.subr.bf16.mxu1 %v2174_v53  ;;  %v2242_v46 = vld [vmem:[#allocation8 + $0xc4] ss:$12 sps:$4 sm:$0xff]  }
  0x55   :  { %598 = vmatprep.subr.bf16.mxu0 %v2150_v47  ;;  %v2240_v47 = vld [vmem:[#allocation8 + $0xc0] ss:$12 sps:$4 sm:$0xff]   ;;  %v2253_v53 = vld [vmem:[#allocation8 + $0x1e4] ss:$12 sps:$4 sm:$0xff]  }
  0x57   :  { %1947 = vmatpush3.bf16.msra.mxu1 %v2175_v56  ;;  %v2259_v56 = vld [vmem:[#allocation8 + $0x1b0] ss:$12 sps:$4 sm:$0xff]  }
  0x58   :  { %599 = vmatpush2.bf16.msra.mxu0 %v2154_v50  ;;  %1948 = vmatprep.subr.bf16.mxu1 %v2177_v57  ;;  %v2247_v50 = vld [vmem:[#allocation8 + $0x1f8] ss:$12 sps:$4 sm:$0xff]   ;;  %v2261_v57 = vld [vmem:[#allocation8 + $0x1b4] ss:$12 sps:$4 sm:$0xff]  }
  0x59   :  { %600 = vmatprep.subr.bf16.mxu0 %v2156_v51  ;;  %v2249_v51 = vld [vmem:[#allocation8 + $0x1fc] ss:$12 sps:$4 sm:$0xff]  }
  0x5b   :  { %1949 = vmatpush3.bf16.msra.mxu1 %v2178_v60  ;;  %v2269_v60 = vld [vmem:[#allocation8 + $0x184] ss:$12 sps:$4 sm:$0xff]  }
  0x5c   :  { %601 = vmatpush2.bf16.msra.mxu0 %v2159_v54  ;;  %1950 = vmatprep.subr.bf16.mxu1 %v2180_v61  ;;  %v2255_v54 = vld [vmem:[#allocation8 + $0x1c8] ss:$12 sps:$4 sm:$0xff]   ;;  %v2267_v61 = vld [vmem:[#allocation8 + $0x180] ss:$12 sps:$4 sm:$0xff]  }
  0x5d   :  { %602 = vmatprep.subr.bf16.mxu0 %v2162_v55  ;;  %v2257_v55 = vld [vmem:[#allocation8 + $0x1cc] ss:$12 sps:$4 sm:$0xff]  }
  0x5f   :  { %1951 = vmatpush3.bf16.msra.mxu1 %v2181_v63 }
  0x60   :  { %603 = vmatpush2.bf16.msra.mxu0 %v2165_v58  ;;  %1952 = vmatprep.subr.bf16.mxu1 %v2183_v1  ;;  %v2263_v58 = vld [vmem:[#allocation8 + $0x198] ss:$12 sps:$4 sm:$0xff]  }
  0x61   :  { %604 = vmatprep.subr.bf16.mxu0 %v2167_v59  ;;  %v2265_v59 = vld [vmem:[#allocation8 + $0x19c] ss:$12 sps:$4 sm:$0xff]  }
  0x63   :  { %1953 = vmatpush3.bf16.msra.mxu1 %v2184_v4  ;;  %v164_v4 = vlaneseq }
  0x64   :  { %605 = vmatpush2.bf16.msra.mxu0 %v2170_v62  ;;  %1954 = vmatprep.subr.bf16.mxu1 %v2186_v6  ;;  %v2271_v62 = vld [vmem:[#allocation8 + $0x170] ss:$12 sps:$4 sm:$0xff]  }
  0x65   :  { %2008 = vmatprep.subr.bf16.mxu0 %v2420_v5  ;;  %v2488_v6 = vshrl.u32 %v164_v4, 7 }
  0x67   :  { %607 = vmatmul.mubr.bf16.vlgmr.msra.gmra.mxu0 %v1793_v2  ;;  %1955 = vmatpush3.bf16.msra.mxu1 %v2187_v8  ;;  %v162_v8 = vld [vmem:[%s2590_s2] sm:$0x7] }
  0x68   :  { %2009 = vmatpush3.bf16.msra.mxu0 %v2176_v3  ;;  %2024 = vmatprep.mubr.msk.bf16.mxu0 %vm2421_vm0, %v2420_v5 }
  0x69   :  { %2010 = vmatprep.subr.bf16.mxu0 %v2420_v5  ;;  %1239 = vmatprep.subr.bf16.mxu1 %v2194_v9  ;;  %v170_v9 = vsub.s32 1, %v2488_v6 }
  0x6a   :  { %689 = vmatmul.mubr.bf16.vlgmr.msra.gmra.mxu1 %v1793_v2 }
  0x6b   :  { %1240 = vmatpush1.bf16.msra.mxu1 %v2192_v11  ;;  %v171_v11 = vrot.slane %v162_v8, %v170_v9 }
  0x6c   :  { %2011 = vmatpush3.bf16.msra.mxu0 %v2179_v7  ;;  %1241 = vmatprep.subr.bf16.mxu1 %v2197_v12  ;;  %v166_v7 = vsub.s32 0, %v2488_v6 }
  0x6d   :  { %2012 = vmatprep.subr.bf16.mxu0 %v2420_v5 }
  0x6f   :  { %1242 = vmatpush1.bf16.msra.mxu1 %v2195_v14 }
  0x70   :  { %2013 = vmatpush3.bf16.msra.mxu0 %v2182_v10  ;;  %1243 = vmatprep.subr.bf16.mxu1 %v2200_v15  ;;  %v167_v10 = vrot.slane %v162_v8, %v166_v7 }
  0x71   :  { %2014 = vmatprep.subr.bf16.mxu0 %v2420_v5 }
  0x73   :  { %1244 = vmatpush1.bf16.msra.mxu1 %v2198_v17 }
  0x74   :  { %2015 = vmatpush3.bf16.msra.mxu0 %v2185_v13  ;;  %1245 = vmatprep.subr.bf16.mxu1 %v2203_v18 }
  0x75   :  { %2016 = vmatprep.subr.bf16.mxu0 %v2420_v5 }
  0x77   :  { %1246 = vmatpush1.bf16.msra.mxu1 %v2201_v20 }
  0x78   :  { %2017 = vmatpush3.bf16.msra.mxu0 %v2188_v16  ;;  %1247 = vmatprep.subr.bf16.mxu1 %v2206_v21 }
  0x79   :  { %2018 = vmatprep.subr.bf16.mxu0 %v2420_v5 }
  0x7b   :  { %1248 = vmatpush1.bf16.msra.mxu1 %v2204_v23 }
  0x7c   :  { %2019 = vmatpush3.bf16.msra.mxu0 %v2189_v19  ;;  %1249 = vmatprep.subr.bf16.mxu1 %v2209_v24  ;;  %v2246_v24 = vld [vmem:[#allocation8 + $0x230] ss:$12 sps:$4 sm:$0xff]  }
  0x7d   :  { %2020 = vmatprep.subr.bf16.mxu0 %v2420_v5 }
  0x7f   :  { %1250 = vmatpush1.bf16.msra.mxu1 %v2207_v26 }
  0x80   :  { %2021 = vmatpush3.bf16.msra.mxu0 %v2190_v22  ;;  %1251 = vmatprep.subr.bf16.mxu1 %v2212_v27 }
  0x81   :  { %2022 = vmatprep.subr.bf16.mxu0 %v2420_v5 }
  0x83   :  { %1252 = vmatpush1.bf16.msra.mxu1 %v2210_v28  ;;  %v2250_v28 = vld [vmem:[#allocation8 + $0x218] ss:$12 sps:$4 sm:$0xff]  }
  0x84   :  { %2023 = vmatpush3.bf16.msra.mxu0 %v2191_v25  ;;  %1253 = vmatprep.subr.bf16.mxu1 %v2215_v29 }
  0x85   :  { %1280 = vmatprep.subr.bf16.mxu0 %v2239_v44 }
  0x87   :  { %2025 = vmatmul.mubr.bf16.vlgmr.msra.gmra.mxu0 %v2471_v41  ;;  %1254 = vmatpush1.bf16.msra.mxu1 %v2213_v30  ;;  %v2231_v41 = vld [vmem:[#allocation8 + $0xf0] ss:$12 sps:$4 sm:$0xff]   ;;  %v2254_v30 = vld [vmem:[#allocation8 + $0x200] ss:$12 sps:$4 sm:$0xff]  }
  0x88   :  { %1312 = vmatprep.mubr.bf16.mxu0 %v2419_v0  ;;  %1255 = vmatprep.subr.bf16.mxu1 %v2218_v31  ;;  %v2228_v0 = vld [vmem:[#allocation8 + $0x108] ss:$12 sps:$4 sm:$0xff]  }
  0x89   :  { %1281 = vmatpush1.bf16.msra.mxu0 %v2237_v45  ;;  %v2258_v31 = vld [vmem:[#allocation8 + $0x1e8] ss:$12 sps:$4 sm:$0xff]  }
  0x8a   :  { %1282 = vmatprep.subr.bf16.mxu0 %v2245_v48  ;;  %v2273_v45 = vld [vmem:[#allocation8 + $0x188] ss:$12 sps:$4 sm:$0xff]   ;;  %v2275_v48 = vld [vmem:[#allocation8 + $0x98] ss:$12 sps:$4 sm:$0xff]  }
  0x8b   :  { %1256 = vmatpush2.bf16.msra.mxu1 %v2216_v32  ;;  %v174_v32 = vsub.s32 2, %v2488_v6 }
  0x8c   :  { %1257 = vmatprep.subr.bf16.mxu1 %v2221_v33  ;;  %v2262_v33 = vld [vmem:[#allocation8 + $0x1d0] ss:$12 sps:$4 sm:$0xff]  }
  0x8d   :  { %1283 = vmatpush1.bf16.msra.mxu0 %v2243_v49  ;;  %v2276_v49 = vld [vmem:[#allocation8 + $0x140] ss:$12 sps:$4 sm:$0xff]  }
  0x8e   :  { %1284 = vmatprep.subr.bf16.mxu0 %v2249_v51  ;;  %v2278_v51 = vld [vmem:[#allocation8 + $0x128] ss:$12 sps:$4 sm:$0xff]  }
  0x8f   :  { %1258 = vmatpush2.bf16.msra.mxu1 %v2219_v34 }
  0x90   :  { %1259 = vmatprep.subr.bf16.mxu1 %v2224_v35  ;;  %v175_v35 = vrot.slane %v162_v8, %v174_v32 }
  0x91   :  { %1285 = vmatpush1.bf16.msra.mxu0 %v2247_v50  ;;  %v2277_v50 = vld [vmem:[#allocation8 + $0x80] ss:$12 sps:$4 sm:$0xff]  }
  0x92   :  { %1286 = vmatprep.subr.bf16.mxu0 %v2253_v53  ;;  %v2280_v53 = vld [vmem:[#allocation8 + $0x110] ss:$12 sps:$4 sm:$0xff]  }
  0x93   :  { %1260 = vmatpush2.bf16.msra.mxu1 %v2222_v36  ;;  %v2266_v36 = vld [vmem:[#allocation8 + $0x1b8] ss:$12 sps:$4 sm:$0xff]  }
  0x94   :  { %1261 = vmatprep.subr.bf16.mxu1 %v2227_v37 }
  0x95   :  { %1287 = vmatpush1.bf16.msra.mxu0 %v2251_v52  ;;  %v2279_v52 = vld [vmem:[#allocation8 + $0x68] ss:$12 sps:$4 sm:$0xff]  }
  0x96   :  { %1288 = vmatprep.subr.bf16.mxu0 %v2257_v55  ;;  %v2282_v55 = vld [vmem:[#allocation8 + $0xf8] ss:$12 sps:$4 sm:$0xff]  }
  0x97   :  { %1262 = vmatpush2.bf16.msra.mxu1 %v2225_v38 }
  0x98   :  { %1263 = vmatprep.subr.bf16.mxu1 %v2230_v39 }
  0x99   :  { %1289 = vmatpush1.bf16.msra.mxu0 %v2255_v54  ;;  %v2281_v54 = vld [vmem:[#allocation8 + $0x50] ss:$12 sps:$4 sm:$0xff]  }
  0x9a   :  { %1290 = vmatprep.subr.bf16.mxu0 %v2261_v57  ;;  %v2284_v57 = vld [vmem:[#allocation8 + $0xe0] ss:$12 sps:$4 sm:$0xff]  }
  0x9b   :  { %1264 = vmatpush2.bf16.msra.mxu1 %v2228_v0  ;;  %v2270_v0 = vld [vmem:[#allocation8 + $0x1a0] ss:$12 sps:$4 sm:$0xff]  }
  0x9c   :  { %1265 = vmatprep.subr.bf16.mxu1 %v2233_v40 }
  0x9d   :  { %1291 = vmatpush1.bf16.msra.mxu0 %v2259_v56  ;;  %v2283_v56 = vld [vmem:[#allocation8 + $0x38] ss:$12 sps:$4 sm:$0xff]  }
  0x9e   :  { %1292 = vmatprep.subr.bf16.mxu0 %v2265_v59  ;;  %v2286_v59 = vld [vmem:[#allocation8 + $0xc8] ss:$12 sps:$4 sm:$0xff]  }
  0x9f   :  { %1266 = vmatpush2.bf16.msra.mxu1 %v2231_v41 }
  0xa0   :  { %1267 = vmatprep.subr.bf16.mxu1 %v2236_v42 }
  0xa1   :  { %1293 = vmatpush1.bf16.msra.mxu0 %v2263_v58  ;;  %v2285_v58 = vld [vmem:[#allocation8 + $0x20] ss:$12 sps:$4 sm:$0xff]  }
  0xa2   :  { %1294 = vmatprep.subr.bf16.mxu0 %v2269_v60  ;;  %v2287_v60 = vld [vmem:[#allocation8 + $0x8] ss:$12 sps:$4 sm:$0xff]  }
  0xa3   :  { %1268 = vmatpush2.bf16.msra.mxu1 %v2234_v43  ;;  %v2272_v43 = vld [vmem:[#allocation8 + $0xb0] ss:$12 sps:$4 sm:$0xff]  }
  0xa4   :  { %1269 = vmatprep.subr.bf16.mxu1 %v2242_v46  ;;  %v2274_v46 = vld [vmem:[#allocation8 + $0x158] ss:$12 sps:$4 sm:$0xff]  }
  0xa5   :  { %1295 = vmatpush1.bf16.msra.mxu0 %v2267_v61 }
  0xa6   :  { %1971 = vmatprep.subr.bf16.mxu0 %v2271_v62 }
  0xa7   :  { %1270 = vmatpush2.bf16.msra.mxu1 %v2240_v47 }
  0xa8   :  { %2028 = vmatprep.subr.bf16.mxu1 %v2420_v5 }
 0x10a   :  { %v649_v63 = vpop.f32.mrf.mxu1 }
 0x10c   :  { %v651_v1 = vpop.f32.mrf.mxu1 }
 0x10e   :  { %v653_v2 = vpop.f32.mrf.mxu1 }
 0x10f   :  { %v838_v2 = vld [vmem:[%s2592_s4] sm:$0x7]  ;;  %s2422_s4 = smov [#allocation9]  }
 0x110   :  { %v654_v3 = vpop.f32.mrf.mxu1  ;;  %s1767_s14 = sshll.u32 %s2422_s4, 4  ;;  %s1768_s14 = int_to_ptr.vmem [resolvable:$true] %s1767_s14 }
 0x111   :  { %v843_v3 = vrot.slane %v838_v2, %v166_v7  ;;  %v847_v7 = vrot.slane %v838_v2, %v170_v9  ;;  %s2378_s15 = scalar_lea.vmem %s1768_s14, 384  ;;  %p2383_p2 = scmp.lt.s32.totalorder %s1768_s14, %s1768_s14 }
 0x112   :  { %p2379_p1 = scmp.ne.s32.totalorder %s1768_s14, %s2378_s15  ;;  %p2384_p3 = scmp.lt.s32.totalorder %s2378_s15, %s2378_s15 }
 0x114   :  { %p2385_p4 = por %p2384_p3, %p2383_p2 }
 0x116   :  { %p2386_p5 = pnand %p2385_p4, %p2379_p1 }
 0x127   :  { %v608_v12 = vpop.f32.mrf.mxu0 }
 0x128   :  { %v609_v13 = vadd.f32 %v608_v12, %v167_v10 }
 0x129   :  { %v610_v14 = vpop.f32.mrf.mxu0 }
 0x12a   :  { %v650_v15 = vadd.f32 %v649_v63, %v609_v13  ;;  %v611_v16 = vadd.f32 %v610_v14, %v171_v11  ;;  %v1956_v22 = vpop.f32.mrf.mxu1 }
 0x12b   :  { %v612_v17 = vpop.f32.mrf.mxu0 }
 0x12c   :  { %v652_v18 = vadd.f32 %v651_v1, %v611_v16  ;;  %v736_v19 = vmax.f32 %v650_v15, 0.0  ;;  %v1957_v26 = vpop.f32.mrf.mxu1 }
 0x12d   :  { %v613_v20 = vpop.f32.mrf.mxu0  ;;  %v1958_v34 = vadd.f32 %v1957_v26, %v1956_v22 }
 0x12e   :  { %v737_v21 = vmax.f32 %v652_v18, 0.0  ;;  %v2499_v25 = vpack.c.bf16 %v736_v19, %v736_v19  ;;  %v1959_v27 = vpop.f32.mrf.mxu1 }
 0x12f   :  { %v691_v37 = vadd.f32 %v1958_v34, %v175_v35 }
 0x130   :  { %v740_v23 = vpack.c.bf16 %v737_v21, %v737_v21  ;;  %v1960_v29 = vpop.f32.mrf.mxu1  ;;  %v851_v21 = vrot.slane %v838_v2, %v174_v32 }
 0x132   :  { %1271 = vmatprep.mubr.bf16.mxu1 %v740_v23 }
 0x133   :  { %1272 = vmatmul.mubr.bf16.vlgmr.msra.gmra.mxu1 %v2499_v25 }
 0x134   :  { %2029 = vmatpush3.bf16.msra.mxu1 %v2246_v24  ;;  %2044 = vmatprep.mubr.msk.bf16.mxu1 %vm2421_vm0, %v2420_v5 }
 0x135   :  { %2030 = vmatprep.subr.bf16.mxu1 %v2420_v5 }
 0x138   :  { %2031 = vmatpush3.bf16.msra.mxu1 %v2250_v28 }
 0x139   :  { %2032 = vmatprep.subr.bf16.mxu1 %v2420_v5 }
 0x13c   :  { %2033 = vmatpush3.bf16.msra.mxu1 %v2254_v30 }
 0x13d   :  { %2034 = vmatprep.subr.bf16.mxu1 %v2420_v5 }
 0x140   :  { %2035 = vmatpush3.bf16.msra.mxu1 %v2258_v31 }
 0x141   :  { %2036 = vmatprep.subr.bf16.mxu1 %v2420_v5 }
 0x144   :  { %2037 = vmatpush3.bf16.msra.mxu1 %v2262_v33 }
 0x145   :  { %2038 = vmatprep.subr.bf16.mxu1 %v2420_v5 }
 0x147   :  { %v730_v38 = vpop.f32.mrf.mxu0 }
 0x148   :  { %v731_v39 = vadd.f32 %v730_v38, %v691_v37  ;;  %2039 = vmatpush3.bf16.msra.mxu1 %v2266_v36 }
 0x149   :  { %v2026_v40 = vpop.f32.mrf.mxu0  ;;  %2040 = vmatprep.subr.bf16.mxu1 %v2420_v5 }
 0x14a   :  { %v738_v41 = vmax.f32 %v731_v39, 0.0 }
 0x14b   :  { %v733_v42 = vpop.f32.mrf.mxu0 }
 0x14c   :  { %v741_v44 = vpack.c.bf16 %v738_v41, %v738_v41  ;;  %2041 = vmatpush3.bf16.msra.mxu1 %v2270_v0 }
 0x14d   :  { %v2027_v47 = vpop.f32.mrf.mxu0  ;;  %2042 = vmatprep.subr.bf16.mxu1 %v2420_v5 }
 0x14e   :  { %1313 = vmatmul.mubr.bf16.vlgmr.msra.gmra.mxu0 %v741_v44  ;;  %v1508_v47 = vand.u32 127, %v164_v4 }
 0x14f   :  { %1972 = vmatpush3.bf16.msra.mxu0 %v2272_v43  ;;  %1353 = vmatprep.mubr.bf16.mxu0 %v740_v23 }
 0x150   :  { %2043 = vmatpush3.bf16.msra.mxu1 %v2273_v45  ;;  %1973 = vmatprep.subr.bf16.mxu0 %v2274_v46  ;;  %vm1584_vm1 = vcmp.ge.s32.totalorder %v1508_v47, 8  ;;  %vm1585_vm2 = vcmp.lt.s32.totalorder %v1508_v47, 16  ;;  %vm1514_vm3 = vcmp.lt.s32.totalorder %v1508_v47, 8  ;;  %vm1653_vm6 = vcmp.ge.s32.totalorder %v1508_v47, 16 }
 0x151   :  { %2063 = vmatprep.subr.mxu1 %v2420_v5  ;;  %vm2543_vm5 = vmand %vm1584_vm1, %vm1585_vm2  ;;  %vm1654_vm7 = vcmp.lt.s32.totalorder %v1508_v47, 24 }
 0x152   :  { %vm1655_vm8 = vmand %vm1653_vm6, %vm1654_vm7 }
 0x153   :  { %1974 = vmatpush3.bf16.msra.mxu0 %v2275_v48  ;;  %2045 = vmatmul.mubr.bf16.vlgmr.msra.gmra.mxu1 %v741_v44 }
 0x154   :  { %1975 = vmatprep.subr.bf16.mxu0 %v2276_v49  ;;  %2057 = vmatprep.mubr.msk.f32.mxu1 %vm2421_vm0, %v2420_v5 }
 0x157   :  { %1976 = vmatpush3.bf16.msra.mxu0 %v2277_v50 }
 0x158   :  { %1977 = vmatprep.subr.bf16.mxu0 %v2278_v51 }
 0x15b   :  { %1978 = vmatpush3.bf16.msra.mxu0 %v2279_v52 }
 0x15c   :  { %1979 = vmatprep.subr.bf16.mxu0 %v2280_v53 }
 0x15f   :  { %1980 = vmatpush3.bf16.msra.mxu0 %v2281_v54 }
 0x160   :  { %1981 = vmatprep.subr.bf16.mxu0 %v2282_v55 }
 0x163   :  { %1982 = vmatpush3.bf16.msra.mxu0 %v2283_v56 }
 0x164   :  { %1983 = vmatprep.subr.bf16.mxu0 %v2284_v57 }
 0x167   :  { %1984 = vmatpush3.bf16.msra.mxu0 %v2285_v58 }
 0x168   :  { %1985 = vmatprep.subr.bf16.mxu0 %v2286_v59 }
 0x16b   :  { %1986 = vmatpush3.bf16.msra.mxu0 %v2287_v60 }
 0x16c   :  { %2048 = vmatprep.subr.mxu0 %v2420_v5 }
 0x16e   :  { %1354 = vmatmul.mubr.bf16.vlgmr.msra.gmra.mxu0 %v2499_v25 }
 0x16f   :  { %2054 = vmatprep.mubr.msk.f32.mxu0 %vm2421_vm0, %v2420_v5 }
 0x1f3   :  { %v1273_v61 = vpop.f32.mrf.mxu1 }
 0x1f4   :  { %v1274_v8 = vadd.f32 %v1273_v61, %v843_v3 }
 0x1f5   :  { %v1275_v62 = vpop.f32.mrf.mxu1 }
 0x1f6   :  { %v1276_v27 = vadd.f32 %v1275_v62, %v847_v7 }
 0x1f7   :  { %v1277_v63 = vpop.f32.mrf.mxu1 }
 0x1f9   :  { %v1278_v1 = vpop.f32.mrf.mxu1 }
 0x20e   :  { %v1314_v10 = vpop.f32.mrf.mxu0 }
 0x20f   :  { %v1315_v11 = vadd.f32 %v1314_v10, %v1274_v8 }
 0x210   :  { %v1316_v12 = vpop.f32.mrf.mxu0 }
 0x211   :  { %v1401_v13 = vmul.f32 %v1315_v11, %v1315_v11  ;;  %v1317_v29 = vadd.f32 %v1316_v12, %v1276_v27 }
 0x212   :  { %v1318_v14 = vpop.f32.mrf.mxu0 }
 0x213   :  { %v1395_v15 = vpop.f32.mrf.mxu1  ;;  %1402 = vadd.xlane.f32.xlu1 %v1401_v13  ;;  %v1408_v31 = vmul.f32 %v1317_v29, %v1317_v29 }
 0x214   :  { %v1319_v16 = vpop.f32.mrf.mxu0 }
 0x215   :  { %v2046_v17 = vpop.f32.mrf.mxu1 }
 0x217   :  { %v1398_v18 = vpop.f32.mrf.mxu1 }
 0x219   :  { %v2047_v19 = vpop.f32.mrf.mxu1 }
 0x22e   :  { %v1987_v20 = vpop.f32.mrf.mxu0 }
 0x230   :  { %v1988_v22 = vpop.f32.mrf.mxu0 }
 0x231   :  { %v1989_v23 = vadd.f32 %v1988_v22, %v1987_v20 }
 0x232   :  { %v1990_v24 = vpop.f32.mrf.mxu0 }
 0x233   :  { %v1356_v25 = vadd.f32 %v1989_v23, %v851_v21 }
 0x234   :  { %v1991_v26 = vpop.f32.mrf.mxu0 }
 0x235   :  { %v1396_v28 = vadd.f32 %v1395_v15, %v1356_v25 }
 0x237   :  { %v1416_v30 = vmul.f32 %v1396_v28, %v1396_v28 }
 0x239   :  { %1417 = vadd.xlane.f32.xlu0 %v1416_v30 }
 0x23d   :  { %1409 = vadd.xlane.f32.xlu0 %v1408_v31 }
 0x29c   :  { %v1403_v33 = vpop.xlane.xlu1 %1402 }
 0x29d   :  { %v1404_v34 = vmax.f32 %v1403_v33, 1e-24 }
 0x29f   :  { %2288 = vrsqrt.f32 %v1404_v34 }
 0x2ac   :  { %v2289_v35 = vpop.eup %2288 }
 0x2ad   :  { %v1406_v32 = vmul.f32 %v2289_v35, %v1315_v11 }
 0x2af   :  { %1407 = vst [vmem:[#allocation9] sm:$0xff] %v1406_v32  ;;  %v1424_v44 = vmul.f32 14.285714, %v1406_v32 }
 0x2c2   :  { %v1418_v36 = vpop.xlane.xlu0 %1417 }
 0x2c3   :  { %v1419_v6 = vmax.f32 %v1418_v36, 1e-24 }
 0x2c5   :  { %2290 = vrsqrt.f32 %v1419_v6 }
 0x2c6   :  { %v1410_v9 = vpop.xlane.xlu0 %1409 }
 0x2c7   :  { %v1411_v37 = vmax.f32 %v1410_v9, 1e-24 }
 0x2c9   :  { %2292 = vrsqrt.f32 %v1411_v37 }
 0x2d2   :  { %v2291_v38 = vpop.eup %2290 }
 0x2d3   :  { %v1421_v39 = vmul.f32 %v2291_v38, %v1396_v28 }
 0x2d5   :  { %1423 = vst [vmem:[#allocation9 + $0x10] sm:$0xff] %v1421_v39  ;;  %2049 = vmatpush3.xpose.msra.mxu0 %v1421_v39  ;;  %2066 = vmatpush3.xpose.msra.mxu1 %v1421_v39  ;;  %v2530_v0 = vmul.f32 %v1421_v39, %v1406_v32  ;;  %v1426_v46 = vmul.f32 14.285714, %v1421_v39 }
 0x2d6   :  { %v2293_v40 = vpop.eup %2292  ;;  %2050 = vmatprep.subr.mxu0 %v2420_v5  ;;  %2064 = vmatprep.subr.mxu1 %v2420_v5 }
 0x2d7   :  { %v1413_v41 = vmul.f32 %v2293_v40, %v1317_v29 }
 0x2d9   :  { %1415 = vst [vmem:[#allocation9 + $0x8] sm:$0xff] %v1413_v41  ;;  %2051 = vmatpush3.xpose.msra.mxu0 %v1413_v41  ;;  %2067 = vmatpush3.xpose.msra.mxu1 %v1413_v41  ;;  %v2534_v42 = vmul.f32 %v1413_v41, %v1406_v32  ;;  %v2536_v43 = vmul.f32 %v1421_v39, %v1413_v41  ;;  %v1425_v45 = vmul.f32 14.285714, %v1413_v41 }
 0x2da   :  { %2052 = vmatprep.subr.mxu0 %v2420_v5  ;;  %2065 = vmatprep.subr.mxu1 %v2420_v5 }
 0x2dd   :  { %2053 = vmatpush3.xpose.msra.mxu0 %v1406_v32  ;;  %2068 = vmatpush3.xpose.msra.mxu1 %v1406_v32 }
 0x2e0   :  { %2055 = vmatmul.mubr.f32.vlgmr.msra.gmra.mxu0 %v1424_v44  ;;  %2058 = vmatmul.mubr.f32.vlgmr.msra.gmra.mxu1 %v1425_v45 }
 0x2e1   :  { %2060 = vmatprep.mubr.msk.f32.mxu1 %vm2421_vm0, %v2420_v5 }
 0x2e4   :  { %2061 = vmatmul.mubr.f32.gmra.mxu1 %v1426_v46 }
 0x3a0   :  { %v1493_v48 = vpop.f32.mrf.mxu0  ;;  %v1498_v49 = vpop.f32.mrf.mxu1 }
 0x3a1   :  { %v1517_v51 = vsel %vm1514_vm3, %v1498_v49, -1e+30  ;;  %v1587_v4 = vsel %vm2543_vm5, %v1493_v48, -1e+30  ;;  %v1656_v60 = vsel %vm1655_vm8, %v1493_v48, -1e+30 }
 0x3a2   :  { %v2056_v52 = vpop.f32.mrf.mxu0  ;;  %v2059_v5 = vpop.f32.mrf.mxu1  ;;  %v1523_v53 = vsel %vm1519_vm4, %v1517_v51, -inf  ;;  %v1590_v58 = vsel %vm1519_vm4, %v1587_v4, -inf  ;;  %v1659_v62 = vsel %vm1519_vm4, %v1656_v60, -inf  ;;  %v1657_v63 = vsel %vm1655_vm8, %v1498_v49, -1e+30 }
 0x3a3   :  { %1524 = vmax.xlane.f32.xlu1 %v1523_v53  ;;  %v1662_v1 = vsel %vm1519_vm4, %v1657_v63, -inf }
 0x3a4   :  { %v1503_v54 = vpop.f32.mrf.mxu1 }
 0x3a5   :  { %v1518_v55 = vsel %vm1514_vm3, %v1503_v54, -1e+30  ;;  %v1589_v59 = vsel %vm2543_vm5, %v1503_v54, -1e+30 }
 0x3a6   :  { %v2062_v56 = vpop.f32.mrf.mxu1  ;;  %v1526_v57 = vsel %vm1519_vm4, %v1518_v55, -inf  ;;  %v1596_v61 = vsel %vm1519_vm4, %v1589_v59, -inf }
 0x3a7   :  { %1527 = vmax.xlane.f32.xlu0 %v1526_v57  ;;  %1591 = vmax.xlane.f32.xlu1 %v1590_v58 }
 0x3ab   :  { %1597 = vmax.xlane.f32.xlu0 %v1596_v61  ;;  %1660 = vmax.xlane.f32.xlu1 %v1659_v62 }
 0x3af   :  { %1663 = vmax.xlane.f32.xlu0 %v1662_v1 }
 0x42c   :  { %v2559_v2 = vpop.xlane.xlu1 %1524 }
 0x42d   :  { %v1530_v3 = vsub.f32 %v1517_v51, %v2559_v2 }
 0x42f   :  { %v1534_v8 = vmul.f32 1.442695, %v1530_v3 }
 0x430   :  { %v2562_v10 = vpop.xlane.xlu0 %1527  ;;  %v1592_v11 = vpop.xlane.xlu1 %1591 }
 0x431   :  { %2294 = vpow2.f32 %v1534_v8  ;;  %v1531_v12 = vsub.f32 %v1518_v55, %v2562_v10  ;;  %v1599_v13 = vsub.f32 %v1587_v4, %v1592_v11 }
 0x433   :  { %v1536_v14 = vmul.f32 1.442695, %v1531_v12  ;;  %v1602_v15 = vmul.f32 1.442695, %v1599_v13 }
 0x434   :  { %v1598_v16 = vpop.xlane.xlu0 %1597  ;;  %v1661_v17 = vpop.xlane.xlu1 %1660 }
 0x435   :  { %2296 = vpow2.f32 %v1536_v14  ;;  %v1601_v18 = vsub.f32 %v1589_v59, %v1598_v16  ;;  %v1668_v19 = vsub.f32 %v1656_v60, %v1661_v17 }
 0x436   :  { %2298 = vpow2.f32 %v1602_v15 }
 0x437   :  { %v1606_v20 = vmul.f32 1.442695, %v1601_v18  ;;  %v1671_v21 = vmul.f32 1.442695, %v1668_v19 }
 0x438   :  { %v1664_v22 = vpop.xlane.xlu0 %1663 }
 0x439   :  { %2300 = vpow2.f32 %v1606_v20  ;;  %v1669_v7 = vsub.f32 %v1657_v63, %v1664_v22 }
 0x43a   :  { %2302 = vpow2.f32 %v1671_v21 }
 0x43b   :  { %v1673_v23 = vmul.f32 1.442695, %v1669_v7 }
 0x43d   :  { %2304 = vpow2.f32 %v1673_v23 }
 0x43e   :  { %v2295_v24 = vpop.eup %2294 }
 0x43f   :  { %v1541_v25 = vsel %vm1519_vm4, %v2295_v24, 0.0 }
 0x440   :  { %1542 = vadd.xlane.f32.xlu1 %v1541_v25 }
 0x442   :  { %v2297_v26 = vpop.eup %2296 }
 0x443   :  { %v2299_v27 = vpop.eup %2298  ;;  %v1544_v28 = vsel %vm1519_vm4, %v2297_v26, 0.0 }
 0x444   :  { %1545 = vadd.xlane.f32.xlu0 %v1544_v28  ;;  %v1608_v29 = vsel %vm1519_vm4, %v2299_v27, 0.0 }
 0x445   :  { %1609 = vadd.xlane.f32.xlu1 %v1608_v29 }
 0x446   :  { %v2301_v30 = vpop.eup %2300 }
 0x447   :  { %v2303_v31 = vpop.eup %2302  ;;  %v1614_v33 = vsel %vm1519_vm4, %v2301_v30, 0.0 }
 0x448   :  { %1615 = vadd.xlane.f32.xlu0 %v1614_v33  ;;  %v1677_v34 = vsel %vm1519_vm4, %v2303_v31, 0.0 }
 0x449   :  { %1678 = vadd.xlane.f32.xlu1 %v1677_v34 }
 0x44a   :  { %v2305_v35 = vpop.eup %2304 }
 0x44b   :  { %v1680_v32 = vsel %vm1519_vm4, %v2305_v35, 0.0 }
 0x44c   :  { %1681 = vadd.xlane.f32.xlu0 %v1680_v32 }
 0x450   :  { %1723 = vadd.xlane.f32.xlu0 %v2534_v42 }
 0x4c9   :  { %v1543_v36 = vpop.xlane.xlu1 %1542 }
 0x4cd   :  { %v1546_v6 = vpop.xlane.xlu0 %1545 }
 0x4ce   :  { %v1610_v9 = vpop.xlane.xlu1 %1609 }
 0x4cf   :  { %2306 = vlog2.f32 %v1610_v9 }
 0x4d0   :  { %2308 = vlog2.f32 %v1543_v36 }
 0x4d1   :  { %2310 = vlog2.f32 %v1546_v6  ;;  %v1616_v37 = vpop.xlane.xlu0 %1615 }
 0x4d2   :  { %2312 = vlog2.f32 %v1616_v37  ;;  %v1679_v38 = vpop.xlane.xlu1 %1678 }
 0x4d3   :  { %2314 = vlog2.f32 %v1679_v38 }
 0x4d5   :  { %v1682_v39 = vpop.xlane.xlu0 %1681 }
 0x4d6   :  { %2316 = vlog2.f32 %v1682_v39 }
 0x4dc   :  { %v2307_v40 = vpop.eup %2306 }
 0x4dd   :  { %v2309_v41 = vpop.eup %2308  ;;  %v1618_v44 = vmul.f32 0.6931472, %v2307_v40 }
 0x4de   :  { %v2311_v45 = vpop.eup %2310  ;;  %v1550_v5 = vmul.f32 0.6931472, %v2309_v41 }
 0x4df   :  { %v2313_v46 = vpop.eup %2312  ;;  %v1623_v42 = vadd.f32 %v1618_v44, %v1592_v11  ;;  %v1552_v50 = vmul.f32 0.6931472, %v2311_v45 }
 0x4e0   :  { %v2315_v47 = vpop.eup %2314  ;;  %v1622_v48 = vmul.f32 0.6931472, %v2313_v46  ;;  %v1554_v61 = vadd.f32 %v1550_v5, %v2559_v2 }
 0x4e1   :  { %v1687_v49 = vmul.f32 0.6931472, %v2315_v47  ;;  %v1638_v4 = vsel %vm1568_vm9, %v1623_v42, 0.0  ;;  %v1555_v58 = vadd.f32 %v1552_v50, %v2562_v10 }
 0x4e2   :  { %v1625_v51 = vadd.f32 %v1622_v48, %v1598_v16  ;;  %v1570_v1 = vsel %vm1568_vm9, %v1554_v61, 0.0 }
 0x4e3   :  { %v2317_v52 = vpop.eup %2316  ;;  %v1692_v55 = vadd.f32 %v1687_v49, %v1661_v17  ;;  %v1572_v63 = vsel %vm1568_vm9, %v1555_v58, 0.0 }
 0x4e4   :  { %v1689_v53 = vmul.f32 0.6931472, %v2317_v52  ;;  %v1641_v54 = vsel %vm1568_vm9, %v1625_v51, 0.0  ;;  %v1573_v3 = vadd.f32 %v1572_v63, %v1570_v1 }
 0x4e5   :  { %v1642_v56 = vadd.f32 %v1641_v54, %v1638_v4  ;;  %v1707_v59 = vsel %vm1568_vm9, %v1692_v55, 0.0 }
 0x4e6   :  { %v1693_v57 = vadd.f32 %v1689_v53, %v1664_v22 }
 0x4e7   :  { %1643 = vadd.xlane.f32.xlu0 %v1642_v56 }
 0x4e8   :  { %v1708_v60 = vsel %vm1568_vm9, %v1693_v57, 0.0 }
 0x4e9   :  { %v1709_v62 = vadd.f32 %v1708_v60, %v1707_v59 }
 0x4eb   :  { %1745 = vadd.xlane.f32.xlu0 %v2536_v43  ;;  %1712 = vadd.xlane.f32.xlu1 %v1709_v62 }
 0x4ef   :  { %1574 = vadd.xlane.f32.xlu1 %v1573_v3 }
 0x4f3   :  { %1734 = vadd.xlane.f32.xlu1 %v2530_v0 }
 0x4f4   :  { %2389 = shalt.err (!%p2386_p5)
}
 0x4f5   :  { %s2423_s16 = smov 128   ;;  %s2424_s17 = smov 8   ;;  %v1724_v43 = vpop.xlane.xlu0 %1723 }
 0x4f6   :  { %1773 = dma.vmem_to_hbm [thread:$0]  %s1768_s14, 384, %s2593_s5, [#allocation4], %s2423_s16, %s2423_s16, %s2424_s17   ;;  %v1725_v0 = vrot.slane %v1724_v43, 4 }
 0x4f7   :  { %s2425_s8 = smov [#allocation10]  }
 0x4f8   :  { %v1726_v15 = vadd.f32 %v1725_v0, %v1724_v43 }
 0x4fa   :  { %v1727_v22 = vrot.slane %v1726_v15, 2 }
 0x4fc   :  { %v1728_v29 = vadd.f32 %v1727_v22, %v1726_v15 }
 0x4fe   :  { %v1729_v6 = vrot.slane %v1728_v29, 1 }
 0x500   :  { %v1730_v44 = vadd.f32 %v1729_v6, %v1728_v29 }
 0x570   :  { %v1644_v2 = vpop.xlane.xlu0 %1643 }
 0x571   :  { %v1645_v8 = vrot.slane %v1644_v2, 4 }
 0x573   :  { %v1646_v10 = vadd.f32 %v1645_v8, %v1644_v2 }
 0x574   :  { %v1746_v11 = vpop.xlane.xlu0 %1745  ;;  %v1713_v12 = vpop.xlane.xlu1 %1712 }
 0x575   :  { %v1747_v13 = vrot.slane %v1746_v11, 4  ;;  %v1714_v14 = vrot.slane %v1713_v12, 4  ;;  %v1647_v17 = vrot.slane %v1646_v10, 2 }
 0x577   :  { %v1715_v16 = vadd.f32 %v1714_v14, %v1713_v12  ;;  %v1748_v18 = vadd.f32 %v1747_v13, %v1746_v11  ;;  %v1648_v25 = vadd.f32 %v1647_v17, %v1646_v10 }
 0x578   :  { %v1575_v19 = vpop.xlane.xlu1 %1574 }
 0x579   :  { %v1716_v20 = vrot.slane %v1715_v16, 2  ;;  %v1576_v21 = vrot.slane %v1575_v19, 4  ;;  %v1749_v23 = vrot.slane %v1748_v18, 2  ;;  %v1649_v34 = vrot.slane %v1648_v25, 1 }
 0x57b   :  { %v1577_v7 = vadd.f32 %v1576_v21, %v1575_v19  ;;  %v1717_v28 = vadd.f32 %v1716_v20, %v1715_v16  ;;  %v1750_v33 = vadd.f32 %v1749_v23, %v1748_v18  ;;  %v1650_v38 = vadd.f32 %v1649_v34, %v1648_v25 }
 0x57c   :  { %v1735_v24 = vpop.xlane.xlu1 %1734 }
 0x57d   :  { %v1578_v26 = vrot.slane %v1577_v7, 2  ;;  %v1736_v27 = vrot.slane %v1735_v24, 4  ;;  %v1718_v36 = vrot.slane %v1717_v28, 1  ;;  %v1751_v39 = vrot.slane %v1750_v33, 1 }
 0x57f   :  { %v1737_v30 = vadd.f32 %v1736_v27, %v1735_v24  ;;  %v1579_v31 = vadd.f32 %v1578_v26, %v1577_v7  ;;  %v1719_v40 = vadd.f32 %v1718_v36, %v1717_v28  ;;  %v1752_v46 = vadd.f32 %v1751_v39, %v1750_v33 }
 0x581   :  { %v1738_v35 = vrot.slane %v1737_v30, 2  ;;  %v1580_v32 = vrot.slane %v1579_v31, 1 }
 0x583   :  { %v1739_v9 = vadd.f32 %v1738_v35, %v1737_v30  ;;  %v1581_v37 = vadd.f32 %v1580_v32, %v1579_v31 }
 0x585   :  { %2069 = vpush %v1581_v37  ;;  %v1740_v41 = vrot.slane %v1739_v9, 1 }
 0x586   :  { %2071 = vpush %v1650_v38 }
 0x587   :  { %2073 = vpush %v1719_v40  ;;  %v1741_v45 = vadd.f32 %v1740_v41, %v1739_v9 }
 0x588   :  { %2075 = vpush %v1730_v44 }
 0x589   :  { %2077 = vpush %v1741_v45 }
 0x58a   :  { %2079 = vpush %v1752_v46 }
 0x5b6   :  { %s2070_s5 = spop %2069 }
 0x5b7   :  { %s2072_s20 = spop %2071 }
 0x5b8   :  { %s2074_s21 = spop %2073  ;;  %s1652_s23 = sadd.f32 %s2072_s20, %s2070_s5 }
 0x5b9   :  { %s2076_s22 = spop %2075 }
 0x5ba   :  { %s2078_s24 = spop %2077  ;;  %s1721_s28 = sadd.f32 %s2074_s21, %s1652_s23 }
 0x5bb   :  { %s1743_s25 = sadd.f32 %s2078_s24, %s2076_s22  ;;  %s2080_s26 = spop %2079 }
 0x5bd   :  { %s1754_s27 = sadd.f32 %s2080_s26, %s1743_s25 }
 0x5bf   :  { %s1755_s29 = smul.f32 28.571428, %s1754_s27 }
 0x5c1   :  { %s1756_s30 = ssub.f32 %s1721_s28, %s1755_s29 }
 0x5c3   :  { %s1759_s7 = smul.f32 0.020833334, %s1756_s30 }
 0x5c5   :  { %1761 = sst [smem:[#allocation10]] %s1759_s7 }
 0x5c6   :  { %1781 = dma.smem_to_hbm %s2425_s8, 16, %s2594_s6, [#allocation5]  }
 0x5c7   :  { %2410 = dma.done.wait [#allocation4], 384  }
 0x5c8   :  { %2411 = vsyncadd [#allocation4], 4294966912 }
 0x5c9   :  { %2412 = dma.done.wait [#allocation5], 16  }
 0x5ca   :  { %2413 = vsyncadd [#allocation5], 4294967280 }
 0x5cb   :  { %1788 = sfence }
 0x5cc   :  { %1789 = vsyncpa [#allocation3], 1 }
 0x5cd   :  { %1790 = vsyncpa [#allocation7], 1 }
 0x5ce   :  { %1791 = vsyncpa [#allocation4], 1 }
 0x5cf   :  { %1792 = vsyncpa [#allocation5], 1 }

</bundles_post_ra>
